<compile_context>
chip_gen: v7x
topology: tpu7x:2x2x1
jax: 0.10.0
libtpu: 0.0.40
codegen_flags: <defaults>
</compile_context>

<pallas_src>
import functools

import numpy as np
import jax
import jax.numpy as jnp
from jax import lax
from jax.experimental import pallas as pl
from jax.experimental.pallas import tpu as pltpu

_HI = jax.lax.Precision.HIGHEST   # only for tiny XLA-side ops and the reference


def _spatial_tile(hw, max_lanes=2048):
    """Largest multiple-of-128 divisor of hw that is <= max_lanes (else hw)."""
    if hw <= max_lanes or hw % 128 != 0:
        return hw
    for t in range(max_lanes, 127, -128):
        if hw % t == 0:
            return t
    return hw


# ---------------------------------------------------------------------------
# Kernel A: fused BN(affine) -> ReLU -> 1x1 conv (channel matmul)
# ---------------------------------------------------------------------------
def _bn_relu_conv1x1_kernel(scale_ref, bias_ref, w_ref, x_ref, o_ref):
    # scale/bias: (Cin, 1)  w: (Cout, Cin)  x: (1, Cin, T)  o: (1, Cout, T)
    z = jnp.maximum(x_ref[0] * scale_ref[...] + bias_ref[...], 0.0)
    o_ref[0] = jnp.dot(w_ref[...], z,
                       preferred_element_type=jnp.float32).astype(o_ref.dtype)


def bn_relu_conv1x1(x_flat, prm):
    B, Cin, S = x_flat.shape
    Cout = prm["w"].shape[0]
    T = _spatial_tile(S)
    return pl.pallas_call(
        _bn_relu_conv1x1_kernel,
        out_shape=jax.ShapeDtypeStruct((B, Cout, S), jnp.float32),
        grid_spec=pltpu.PrefetchScalarGridSpec(
            num_scalar_prefetch=0,
            grid=(B, S // T),
            in_specs=[
                pl.BlockSpec((Cin, 1), lambda b, t: (0, 0)),
                pl.BlockSpec((Cin, 1), lambda b, t: (0, 0)),
                pl.BlockSpec((Cout, Cin), lambda b, t: (0, 0)),
                pl.BlockSpec((1, Cin, T), lambda b, t: (b, 0, t)),
            ],
            out_specs=pl.BlockSpec((1, Cout, T), lambda b, t: (b, 0, t)),
        ),
        compiler_params=pltpu.CompilerParams(
            dimension_semantics=("parallel", "parallel")),
    )(prm["scale"], prm["bias"], prm["w"], x_flat)


# ---------------------------------------------------------------------------
# Kernel B: fused bilinear-upsample + add + BN(affine) + ReLU + 3x3 conv (pad=1)
# ---------------------------------------------------------------------------
def _process_kernel(W, s_ref, kt_ref, prev_ref, scale_ref, bias_ref, wbig_ref,
                    m_ref, o_ref):
    # s: (1, Cb, Sp)  kt: (Sp, HW)  prev: (1, Cb, HW)  scale/bias: (Cb, 1)
    # wbig: (Cb, 9*Cb)  m: (4, HW)  o: (1, Cb, HW)
    HW = prev_ref.shape[2]

    # Bilinear upsample of the low-res branch as a single MXU matmul.
    u = jnp.dot(s_ref[0], kt_ref[...], preferred_element_type=jnp.float32)
    z = jnp.maximum((u + prev_ref[0]) * scale_ref[...] + bias_ref[...], 0.0)

    # Source-side boundary masks (factorised: 4 vectors, 8 VPU multiplies,
    # centre tap unmasked).  Zeroing the source row/column that a wrapped roll
    # would read is exactly the zero-padding of the 3x3 conv.
    m = m_ref[...]
    row_m = {-1: m[0:1], 1: m[1:2]}                    # dh = -1 / +1
    col_z = {0: z, -1: z * m[2:3], 1: z * m[3:4]}      # dw =  0 / -1 / +1

    taps = []
    for dh in (-1, 0, 1):
        for dw in (-1, 0, 1):
            zz = col_z[dw]
            if dh != 0:
                zz = zz * row_m[dh]
            k = dh * W + dw                            # flat source offset
            taps.append(pltpu.roll(zz, shift=(-k) % HW, axis=1) if k else zz)

    # Single deep-K matmul: (Cb, 9*Cb) @ (9*Cb, HW).
    zstack = jnp.concatenate(taps, axis=0)
    o_ref[0] = jnp.dot(wbig_ref[...], zstack,
                       preferred_element_type=jnp.float32).astype(o_ref.dtype)


def process_stage(s_pad, kt, prev, prm, masks, W):
    # TODO(synk): for very large H*W, add an H-row grid axis with a 1-row halo
    # instead of processing the whole flat map per batch step.
    B, Cb, Sp = s_pad.shape
    HW = prev.shape[2]
    kernel = functools.partial(_process_kernel, W)
    return pl.pallas_call(
        kernel,
        out_shape=jax.ShapeDtypeStruct((B, Cb, HW), jnp.float32),
        grid_spec=pltpu.PrefetchScalarGridSpec(
            num_scalar_prefetch=0,
            grid=(B,),
            in_specs=[
                pl.BlockSpec((1, Cb, Sp), lambda b: (b, 0, 0)),
                pl.BlockSpec((Sp, HW), lambda b: (0, 0)),
                pl.BlockSpec((1, Cb, HW), lambda b: (b, 0, 0)),
                pl.BlockSpec((Cb, 1), lambda b: (0, 0)),
                pl.BlockSpec((Cb, 1), lambda b: (0, 0)),
                pl.BlockSpec((Cb, 9 * Cb), lambda b: (0, 0)),
                pl.BlockSpec((4, HW), lambda b: (0, 0)),
            ],
            out_specs=pl.BlockSpec((1, Cb, HW), lambda b: (b, 0, 0)),
        ),
        compiler_params=pltpu.CompilerParams(
            dimension_semantics=("parallel",)),
    )(s_pad, kt, prev, prm["scale"], prm["bias"], prm["wbig"], masks)


# ---------------------------------------------------------------------------
# Kernel C: compression(y0..y4) + shortcut(x) as ONE fused matmul (no XLA concat)
# ---------------------------------------------------------------------------
def _compress_shortcut_kernel(scale_ref, bias_ref, w_ref,
                              y0_ref, y1_ref, y2_ref, y3_ref, y4_ref, x_ref,
                              o_ref):
    z = jnp.concatenate([y0_ref[0], y1_ref[0], y2_ref[0], y3_ref[0], y4_ref[0],
                         x_ref[0]], axis=0)                    # (5*Cb + Cin, T)
    z = jnp.maximum(z * scale_ref[...] + bias_ref[...], 0.0)
    o_ref[0] = jnp.dot(w_ref[...], z,
                       preferred_element_type=jnp.float32).astype(o_ref.dtype)


def compress_shortcut(ys, x_flat, prm):
    B, Cb, HW = ys[0].shape
    Cin = x_flat.shape[1]
    Cout, Ctot = prm["w"].shape
    T = _spatial_tile(HW)
    in_specs = ([pl.BlockSpec((Ctot, 1), lambda b, t: (0, 0)),
                 pl.BlockSpec((Ctot, 1), lambda b, t: (0, 0)),
                 pl.BlockSpec((Cout, Ctot), lambda b, t: (0, 0))]
                + [pl.BlockSpec((1, Cb, T), lambda b, t: (b, 0, t))
                   for _ in range(5)]
                + [pl.BlockSpec((1, Cin, T), lambda b, t: (b, 0, t))])
    return pl.pallas_call(
        _compress_shortcut_kernel,
        out_shape=jax.ShapeDtypeStruct((B, Cout, HW), jnp.float32),
        grid_spec=pltpu.PrefetchScalarGridSpec(
            num_scalar_prefetch=0,
            grid=(B, HW // T),
            in_specs=in_specs,
            out_specs=pl.BlockSpec((1, Cout, T), lambda b, t: (b, 0, t)),
        ),
        compiler_params=pltpu.CompilerParams(
            dimension_semantics=("parallel", "parallel")),
    )(prm["scale"], prm["bias"], prm["w"], *ys, x_flat)


# ---------------------------------------------------------------------------
# XLA-side helpers (pooling) + host-side interpolation operators
# ---------------------------------------------------------------------------
def avg_pool_nchw(x, k, s, p):
    # nn.AvgPool2d(k, stride=s, padding=p): count_include_pad=True, ceil_mode=False
    summed = lax.reduce_window(
        x, 0.0, lax.add,
        window_dimensions=(1, 1, k, k),
        window_strides=(1, 1, s, s),
        padding=[(0, 0), (0, 0), (p, p), (p, p)])
    return summed / float(k * k)


def _interp_matrix_np(out_size, in_size):
    # F.interpolate(mode='bilinear', align_corners=False) as a dense matrix.
    i = np.arange(out_size, dtype=np.float64)
    src = (i + 0.5) * (in_size / out_size) - 0.5
    src = np.maximum(src, 0.0)
    i0 = np.minimum(np.floor(src).astype(np.int64), in_size - 1)
    i1 = np.minimum(i0 + 1, in_size - 1)
    w1 = src - i0
    w0 = 1.0 - w1
    A = np.zeros((out_size, in_size), np.float64)
    A[np.arange(out_size), i0] += w0
    A[np.arange(out_size), i1] += w1
    return A.astype(np.float32)


def bilinear_upsample_nchw(x, H, W):
    _, _, hs, ws = x.shape
    Ah = jnp.asarray(_interp_matrix_np(H, hs))
    Aw = jnp.asarray(_interp_matrix_np(W, ws))
    return jnp.einsum("hs,wt,bcst->bchw", Ah, Aw, x, precision=_HI)


# ---------------------------------------------------------------------------
# One-time parameter preparation (hoisted out of the jitted forward)
# ---------------------------------------------------------------------------
def prepare_dappm(P, H, W):
    HW = H * W
    f32 = jnp.float32

    def col(v):
        return jnp.asarray(v, f32).reshape(-1, 1)

    def wbig_3x3(w):
        w = jnp.asarray(w, f32)                                   # (O, I, 3, 3)
        o, i = w.shape[0], w.shape[1]
        w9 = jnp.transpose(w, (2, 3, 0, 1)).reshape(9, o, i)      # tap = kh*3+kw
        return jnp.transpose(w9, (1, 0, 2)).reshape(o, 9 * i)     # (O, 9*I)

    prep = {}
    prep["scale0"] = {"scale": col(P["scale0"]["scale"]),
                      "bias": col(P["scale0"]["bias"]),
                      "w": jnp.asarray(P["scale0"]["w"], f32)}
    for k in ("scale1", "scale2", "scale3", "scale4"):
        prep[k] = P[k]                     # tiny pooled branches stay in plain JAX
    for i in (1, 2, 3, 4):
        pp = P[f"process{i}"]
        prep[f"process{i}"] = {"scale": col(pp["scale"]),
                               "bias": col(pp["bias"]),
                               "wbig": wbig_3x3(pp["w"])}

    # 4 factorised source-side masks for the roll-based 3x3 conv.
    n = np.arange(HW)
    hh, ww = n // W, n % W
    prep["masks3x3"] = jnp.asarray(np.stack([
        (hh != H - 1),        # dh = -1 : zero source row H-1
        (hh != 0),            # dh = +1 : zero source row 0
        (ww != W - 1),        # dw = -1 : zero source col W-1
        (ww != 0),            # dw = +1 : zero source col 0
    ]).astype(np.float32))                                        # (4, HW)

    # Composite bilinear-upsample operators (flat low-res -> flat full-res),
    # padded along the contraction dim to a multiple of 8.
    def pool_out(sz, k, s, p):
        return (sz + 2 * p - k) // s + 1

    low = [(pool_out(H, 5, 2, 2), pool_out(W, 5, 2, 2)),
           (pool_out(H, 9, 4, 4), pool_out(W, 9, 4, 4)),
           (pool_out(H, 17, 8, 8), pool_out(W, 17, 8, 8)),
           (1, 1)]
    kts = []
    for hs, ws in low:
        K = np.kron(_interp_matrix_np(H, hs), _interp_matrix_np(W, ws))  # (HW, S)
        S = hs * ws
        Sp = max(8, ((S + 7) // 8) * 8)
        Kt = np.zeros((Sp, HW), np.float32)
        Kt[:S] = K.T
        kts.append(jnp.asarray(Kt))
    prep["kt"] = kts

    prep["comp_short"] = {
        "scale": jnp.concatenate([col(P["compression"]["scale"]),
                                  col(P["shortcut"]["scale"])], axis=0),
        "bias": jnp.concatenate([col(P["compression"]["bias"]),
                                 col(P["shortcut"]["bias"])], axis=0),
        "w": jnp.concatenate([jnp.asarray(P["compression"]["w"], f32),
                              jnp.asarray(P["shortcut"]["w"], f32)], axis=1),
    }
    return prep


# ---------------------------------------------------------------------------
# DAPPM forward (Pallas path)
# ---------------------------------------------------------------------------
def dappm_forward(x, prep):
    B, Cin, H, W = x.shape
    HW = H * W
    xf = x.reshape(B, Cin, HW)

    # scale0: Pallas fused BN+ReLU+1x1 conv on the lane-dense full-res map.
    y0 = bn_relu_conv1x1(xf, prep["scale0"])

    # Pooled / global branches: BN+ReLU+1x1 conv in plain JAX (sub-128-lane
    # spatial extents); the upsample is fused into the Pallas process kernel.
    def branch(p_flat, prm):
        z = jnp.maximum(p_flat * prm["scale"][None, :, None]
                        + prm["bias"][None, :, None], 0.0)
        return jnp.einsum("oc,bcs->bos", prm["w"], z, precision=_HI)

    pools = (avg_pool_nchw(x, 5, 2, 2),
             avg_pool_nchw(x, 9, 4, 4),
             avg_pool_nchw(x, 17, 8, 8),
             jnp.mean(x, axis=(2, 3), keepdims=True))
    s_list = []
    for p, name in zip(pools, ("scale1", "scale2", "scale3", "scale4")):
        b, c, h, w = p.shape
        s_list.append(branch(p.reshape(b, c, h * w), prep[name]))

    prev = y0
    ys = [y0]
    for i in range(4):
        kt = prep["kt"][i]
        s = s_list[i]
        pad = kt.shape[0] - s.shape[2]
        if pad:
            s = jnp.pad(s, ((0, 0), (0, 0), (0, pad)))
        prev = process_stage(s, kt, prev, prep[f"process{i + 1}"],
                             prep["masks3x3"], W)
        ys.append(prev)

    out = compress_shortcut(ys, xf, prep["comp_short"])
    return out.reshape(B, -1, H, W)


# ---------------------------------------------------------------------------
# Pure-JAX reference (mirrors the PyTorch forward, inference-mode BN, full f32)
# ---------------------------------------------------------------------------
def dappm_reference(x, P):
    _, _, H, W = x.shape

    def bn_relu(v, prm):
        return jnp.maximum(
            v * prm["scale"][None, :, None, None] + prm["bias"][None, :, None, None],
            0.0)

    def conv1x1(v, prm):
        return lax.conv_general_dilated(
            bn_relu(v, prm), prm["w"][:, :, None, None], (1, 1), "VALID",
            dimension_numbers=("NCHW", "OIHW", "NCHW"), precision=_HI)

    def conv3x3(v, prm):
        return lax.conv_general_dilated(
            bn_relu(v, prm), prm["w"], (1, 1), [(1, 1), (1, 1)],
            dimension_numbers=("NCHW", "OIHW", "NCHW"), precision=_HI)

    y0 = conv1x1(x, P["scale0"])
    s1 = conv1x1(avg_pool_nchw(x, 5, 2, 2), P["scale1"])
    s2 = conv1x1(avg_pool_nchw(x, 9, 4, 4), P["scale2"])
    s3 = conv1x1(avg_pool_nchw(x, 17, 8, 8), P["scale3"])
    s4 = conv1x1(jnp.mean(x, axis=(2, 3), keepdims=True), P["scale4"])

    y1 = conv3x3(bilinear_upsample_nchw(s1, H, W) + y0, P["process1"])
    y2 = conv3x3(bilinear_upsample_nchw(s2, H, W) + y1, P["process2"])
    y3 = conv3x3(bilinear_upsample_nchw(s3, H, W) + y2, P["process3"])
    y4 = conv3x3(bilinear_upsample_nchw(s4, H, W) + y3, P["process4"])

    cat = jnp.concatenate([y0, y1, y2, y3, y4], axis=1)
    return conv1x1(cat, P["compression"]) + conv1x1(x, P["shortcut"])


# ---------------------------------------------------------------------------
# Deterministic parameter construction (BN folded to inference scale/bias)
# ---------------------------------------------------------------------------
def make_params(key, inplanes, branch_planes, outplanes):
    ks = jax.random.split(key, 11)

    def bn_conv(k, cin, cout, ksz):
        k1, k2, k3, k4, k5 = jax.random.split(k, 5)
        gamma = jax.random.uniform(k1, (cin,), minval=0.5, maxval=1.5)
        beta = 0.1 * jax.random.normal(k2, (cin,))
        mean = 0.1 * jax.random.normal(k3, (cin,))
        var = jax.random.uniform(k4, (cin,), minval=0.5, maxval=1.5)
        scale = gamma / jnp.sqrt(var + 1e-5)
        bias = beta - mean * scale
        if ksz == 1:
            w = jax.random.normal(k5, (cout, cin)) * (1.0 / cin) ** 0.5
        else:
            w = (jax.random.normal(k5, (cout, cin, ksz, ksz))
                 * (1.0 / (cin * ksz * ksz)) ** 0.5)
        return {"scale": scale.astype(jnp.float32),
                "bias": bias.astype(jnp.float32),
                "w": w.astype(jnp.float32)}

    return {
        "scale0": bn_conv(ks[0], inplanes, branch_planes, 1),
        "scale1": bn_conv(ks[1], inplanes, branch_planes, 1),
        "scale2": bn_conv(ks[2], inplanes, branch_planes, 1),
        "scale3": bn_conv(ks[3], inplanes, branch_planes, 1),
        "scale4": bn_conv(ks[4], inplanes, branch_planes, 1),
        "process1": bn_conv(ks[5], branch_planes, branch_planes, 3),
        "process2": bn_conv(ks[6], branch_planes, branch_planes, 3),
        "process3": bn_conv(ks[7], branch_planes, branch_planes, 3),
        "process4": bn_conv(ks[8], branch_planes, branch_planes, 3),
        "compression": bn_conv(ks[9], branch_planes * 5, outplanes, 1),
        "shortcut": bn_conv(ks[10], inplanes, outplanes, 1),
    }


if __name__ == "__main__":
    B, Cin, H, W = 2, 16, 16, 16          # inplanes=16
    Cb, Cout = 8, 16                      # branch_planes=8, outplanes=16

    key = jax.random.PRNGKey(0)
    kx, kp = jax.random.split(key)
    x = jax.random.normal(kx, (B, Cin, H, W), dtype=jnp.float32)
    P = make_params(kp, Cin, Cb, Cout)
    prep = prepare_dappm(P, H, W)         # one-time prep, hoisted out of jit

    out = jax.block_until_ready(jax.jit(dappm_forward)(x, prep))
    ref = jax.block_until_ready(jax.jit(dappm_reference)(x, P))

    assert out.shape == (B, Cout, H, W), out.shape
    # Kernels run the MXU at default (bf16-pass) precision per the perf review;
    # the pure-f32 reference therefore differs at the ~1e-2 level.
    max_diff = float(jnp.max(jnp.abs(out - ref)))
    assert jnp.allclose(out, ref, atol=5e-2, rtol=5e-2), (
        f"max abs diff {max_diff}")

    print("KERNEL_OK")
</pallas_src>

<mosaic_0001>
module attributes {stable_mosaic.version = 11 : i64} {
  func.func @_bn_relu_conv1x1_kernel(%arg0: i32, %arg1: i32, %arg2: memref<16x1xf32, #tpu.memory_space<vmem>>, %arg3: memref<16x1xf32, #tpu.memory_space<vmem>>, %arg4: memref<8x16xf32, #tpu.memory_space<vmem>>, %arg5: memref<1x16x256xf32, #tpu.memory_space<vmem>>, %arg6: memref<1x8x256xf32, #tpu.memory_space<vmem>>) attributes {dimension_semantics = [#tpu.dimension_semantics<parallel>, #tpu.dimension_semantics<parallel>], iteration_bounds = array<i64: 2, 1>, scalar_prefetch = 0 : i64, scratch_operands = 0 : i64, tpu.core_type = #tpu.core_type<tc>, window_params = [{pipeline_mode = #tpu.pipeline_mode<synchronous>, transform_indices = @transform_0, window_bounds = array<i64: 16, 1>}, {pipeline_mode = #tpu.pipeline_mode<synchronous>, transform_indices = @transform_1, window_bounds = array<i64: 16, 1>}, {pipeline_mode = #tpu.pipeline_mode<synchronous>, transform_indices = @transform_2, window_bounds = array<i64: 8, 16>}, {transform_indices = @transform_3, window_bounds = array<i64: 1, 16, 256>}, {transform_indices = @transform_4, window_bounds = array<i64: 1, 8, 256>}]} {
    %c0 = arith.constant 0 : index
    %c0_0 = arith.constant 0 : index
    %c0_1 = arith.constant 0 : index
    %0 = vector.load %arg5[%c0, %c0_0, %c0_1] : memref<1x16x256xf32, #tpu.memory_space<vmem>>, vector<1x16x256xf32>
    %1 = vector.shape_cast %0 : vector<1x16x256xf32> to vector<16x256xf32>
    %c0_2 = arith.constant 0 : index
    %c0_3 = arith.constant 0 : index
    %2 = vector.load %arg2[%c0_2, %c0_3] : memref<16x1xf32, #tpu.memory_space<vmem>>, vector<16x1xf32>
    %3 = vector.broadcast %2 : vector<16x1xf32> to vector<16x256xf32>
    %4 = arith.mulf %1, %3 : vector<16x256xf32>
    %c0_4 = arith.constant 0 : index
    %c0_5 = arith.constant 0 : index
    %5 = vector.load %arg3[%c0_4, %c0_5] : memref<16x1xf32, #tpu.memory_space<vmem>>, vector<16x1xf32>
    %6 = vector.broadcast %5 : vector<16x1xf32> to vector<16x256xf32>
    %7 = arith.addf %4, %6 : vector<16x256xf32>
    %cst = arith.constant 0.000000e+00 : f32
    %8 = vector.broadcast %cst : f32 to vector<16x256xf32>
    %9 = arith.maximumf %7, %8 : vector<16x256xf32>
    %c0_6 = arith.constant 0 : index
    %c0_7 = arith.constant 0 : index
    %10 = vector.load %arg4[%c0_6, %c0_7] : memref<8x16xf32, #tpu.memory_space<vmem>>, vector<8x16xf32>
    %cst_8 = arith.constant dense<0.000000e+00> : vector<8x256xf32>
    %11 = tpu.matmul %10, %9, %cst_8 {dimension_numbers = #tpu.dot_dimension_numbers<[1], [0], [0], [1], [0, 0, 1, 1], [], []>} : vector<8x16xf32>, vector<16x256xf32>, vector<8x256xf32> -> vector<8x256xf32>
    %c0_9 = arith.constant 0 : index
    %c0_10 = arith.constant 0 : index
    %c0_11 = arith.constant 0 : index
    %12 = vector.load %arg6[%c0_9, %c0_10, %c0_11] : memref<1x8x256xf32, #tpu.memory_space<vmem>>, vector<1x8x256xf32>
    %13 = vector.shape_cast %12 : vector<1x8x256xf32> to vector<8x256xf32>
    %14 = vector.shape_cast %11 : vector<8x256xf32> to vector<1x8x256xf32>
    tpu.vector_store %arg6[%c0_9, %c0_10, %c0_11], %14 {strides = array<i32>} : memref<1x8x256xf32, #tpu.memory_space<vmem>>, vector<1x8x256xf32>,
    return
  }
  func.func @transform_0(%arg0: i32, %arg1: i32) -> (i32, i32) {
    %c0_i32 = arith.constant 0 : i32
    %c0_i32_0 = arith.constant 0 : i32
    %c0_i32_1 = arith.constant 0 : i32
    return %c0_i32, %c0_i32_0 : i32, i32
  }
  func.func @transform_1(%arg0: i32, %arg1: i32) -> (i32, i32) {
    %c0_i32 = arith.constant 0 : i32
    %c0_i32_0 = arith.constant 0 : i32
    %c0_i32_1 = arith.constant 0 : i32
    return %c0_i32, %c0_i32_0 : i32, i32
  }
  func.func @transform_2(%arg0: i32, %arg1: i32) -> (i32, i32) {
    %c0_i32 = arith.constant 0 : i32
    %c0_i32_0 = arith.constant 0 : i32
    %c0_i32_1 = arith.constant 0 : i32
    return %c0_i32, %c0_i32_0 : i32, i32
  }
  func.func @transform_3(%arg0: i32, %arg1: i32) -> (i32, i32, i32) {
    %c0_i32 = arith.constant 0 : i32
    %c0_i32_0 = arith.constant 0 : i32
    return %arg0, %c0_i32, %arg1 : i32, i32, i32
  }
  func.func @transform_4(%arg0: i32, %arg1: i32) -> (i32, i32, i32) {
    %c0_i32 = arith.constant 0 : i32
    %c0_i32_0 = arith.constant 0 : i32
    return %arg0, %c0_i32, %arg1 : i32, i32, i32
  }
}

module attributes {stable_mosaic.version = 11 : i64} {
  func.func @_process_kernel(%arg0: i32, %arg1: memref<1x8x64xf32, #tpu.memory_space<vmem>>, %arg2: memref<64x256xf32, #tpu.memory_space<vmem>>, %arg3: memref<1x8x256xf32, #tpu.memory_space<vmem>>, %arg4: memref<8x1xf32, #tpu.memory_space<vmem>>, %arg5: memref<8x1xf32, #tpu.memory_space<vmem>>, %arg6: memref<8x72xf32, #tpu.memory_space<vmem>>, %arg7: memref<4x256xf32, #tpu.memory_space<vmem>>, %arg8: memref<1x8x256xf32, #tpu.memory_space<vmem>>) attributes {dimension_semantics = [#tpu.dimension_semantics<parallel>], iteration_bounds = array<i64: 2>, scalar_prefetch = 0 : i64, scratch_operands = 0 : i64, tpu.core_type = #tpu.core_type<tc>, window_params = [{transform_indices = @transform_0, window_bounds = array<i64: 1, 8, 64>}, {pipeline_mode = #tpu.pipeline_mode<synchronous>, transform_indices = @transform_1, window_bounds = array<i64: 64, 256>}, {transform_indices = @transform_2, window_bounds = array<i64: 1, 8, 256>}, {pipeline_mode = #tpu.pipeline_mode<synchronous>, transform_indices = @transform_3, window_bounds = array<i64: 8, 1>}, {pipeline_mode = #tpu.pipeline_mode<synchronous>, transform_indices = @transform_4, window_bounds = array<i64: 8, 1>}, {pipeline_mode = #tpu.pipeline_mode<synchronous>, transform_indices = @transform_5, window_bounds = array<i64: 8, 72>}, {pipeline_mode = #tpu.pipeline_mode<synchronous>, transform_indices = @transform_6, window_bounds = array<i64: 4, 256>}, {transform_indices = @transform_7, window_bounds = array<i64: 1, 8, 256>}]} {
    %c0 = arith.constant 0 : index
    %c0_0 = arith.constant 0 : index
    %c0_1 = arith.constant 0 : index
    %0 = vector.load %arg1[%c0, %c0_0, %c0_1] : memref<1x8x64xf32, #tpu.memory_space<vmem>>, vector<1x8x64xf32>
    %1 = vector.shape_cast %0 : vector<1x8x64xf32> to vector<8x64xf32>
    %c0_2 = arith.constant 0 : index
    %c0_3 = arith.constant 0 : index
    %2 = vector.load %arg2[%c0_2, %c0_3] : memref<64x256xf32, #tpu.memory_space<vmem>>, vector<64x256xf32>
    %cst = arith.constant dense<0.000000e+00> : vector<8x256xf32>
    %3 = tpu.matmul %1, %2, %cst {dimension_numbers = #tpu.dot_dimension_numbers<[1], [0], [0], [1], [0, 0, 1, 1], [], []>} : vector<8x64xf32>, vector<64x256xf32>, vector<8x256xf32> -> vector<8x256xf32>
    %c0_4 = arith.constant 0 : index
    %c0_5 = arith.constant 0 : index
    %c0_6 = arith.constant 0 : index
    %4 = vector.load %arg3[%c0_4, %c0_5, %c0_6] : memref<1x8x256xf32, #tpu.memory_space<vmem>>, vector<1x8x256xf32>
    %5 = vector.shape_cast %4 : vector<1x8x256xf32> to vector<8x256xf32>
    %6 = arith.addf %3, %5 : vector<8x256xf32>
    %c0_7 = arith.constant 0 : index
    %c0_8 = arith.constant 0 : index
    %7 = vector.load %arg4[%c0_7, %c0_8] : memref<8x1xf32, #tpu.memory_space<vmem>>, vector<8x1xf32>
    %8 = vector.broadcast %7 : vector<8x1xf32> to vector<8x256xf32>
    %9 = arith.mulf %6, %8 : vector<8x256xf32>
    %c0_9 = arith.constant 0 : index
    %c0_10 = arith.constant 0 : index
    %10 = vector.load %arg5[%c0_9, %c0_10] : memref<8x1xf32, #tpu.memory_space<vmem>>, vector<8x1xf32>
    %11 = vector.broadcast %10 : vector<8x1xf32> to vector<8x256xf32>
    %12 = arith.addf %9, %11 : vector<8x256xf32>
    %cst_11 = arith.constant 0.000000e+00 : f32
    %13 = vector.broadcast %cst_11 : f32 to vector<8x256xf32>
    %14 = arith.maximumf %12, %13 : vector<8x256xf32>
    %c0_12 = arith.constant 0 : index
    %c0_13 = arith.constant 0 : index
    %15 = vector.load %arg7[%c0_12, %c0_13] : memref<4x256xf32, #tpu.memory_space<vmem>>, vector<4x256xf32>
    %16 = vector.extract_strided_slice %15 {offsets = [0, 0], sizes = [1, 256], strides = [1, 1]} : vector<4x256xf32> to vector<1x256xf32>
    %17 = vector.extract_strided_slice %15 {offsets = [1, 0], sizes = [1, 256], strides = [1, 1]} : vector<4x256xf32> to vector<1x256xf32>
    %18 = vector.extract_strided_slice %15 {offsets = [2, 0], sizes = [1, 256], strides = [1, 1]} : vector<4x256xf32> to vector<1x256xf32>
    %19 = vector.broadcast %18 : vector<1x256xf32> to vector<8x256xf32>
    %20 = arith.mulf %14, %19 : vector<8x256xf32>
    %21 = vector.extract_strided_slice %15 {offsets = [3, 0], sizes = [1, 256], strides = [1, 1]} : vector<4x256xf32> to vector<1x256xf32>
    %22 = vector.broadcast %21 : vector<1x256xf32> to vector<8x256xf32>
    %23 = arith.mulf %14, %22 : vector<8x256xf32>
    %24 = vector.broadcast %16 : vector<1x256xf32> to vector<8x256xf32>
    %25 = arith.mulf %20, %24 : vector<8x256xf32>
    %c17_i32 = arith.constant 17 : i32
    %26 = tpu.dynamic_rotate %25 by %c17_i32 dim 1 : vector<8x256xf32>, i32 -> vector<8x256xf32>
    %27 = vector.broadcast %16 : vector<1x256xf32> to vector<8x256xf32>
    %28 = arith.mulf %14, %27 : vector<8x256xf32>
    %c16_i32 = arith.constant 16 : i32
    %29 = tpu.dynamic_rotate %28 by %c16_i32 dim 1 : vector<8x256xf32>, i32 -> vector<8x256xf32>
    %30 = vector.broadcast %16 : vector<1x256xf32> to vector<8x256xf32>
    %31 = arith.mulf %23, %30 : vector<8x256xf32>
    %c15_i32 = arith.constant 15 : i32
    %32 = tpu.dynamic_rotate %31 by %c15_i32 dim 1 : vector<8x256xf32>, i32 -> vector<8x256xf32>
    %c1_i32 = arith.constant 1 : i32
    %33 = tpu.dynamic_rotate %20 by %c1_i32 dim 1 : vector<8x256xf32>, i32 -> vector<8x256xf32>
    %c255_i32 = arith.constant 255 : i32
    %34 = tpu.dynamic_rotate %23 by %c255_i32 dim 1 : vector<8x256xf32>, i32 -> vector<8x256xf32>
    %35 = vector.broadcast %17 : vector<1x256xf32> to vector<8x256xf32>
    %36 = arith.mulf %20, %35 : vector<8x256xf32>
    %c241_i32 = arith.constant 241 : i32
    %37 = tpu.dynamic_rotate %36 by %c241_i32 dim 1 : vector<8x256xf32>, i32 -> vector<8x256xf32>
    %38 = vector.broadcast %17 : vector<1x256xf32> to vector<8x256xf32>
    %39 = arith.mulf %14, %38 : vector<8x256xf32>
    %c240_i32 = arith.constant 240 : i32
    %40 = tpu.dynamic_rotate %39 by %c240_i32 dim 1 : vector<8x256xf32>, i32 -> vector<8x256xf32>
    %41 = vector.broadcast %17 : vector<1x256xf32> to vector<8x256xf32>
    %42 = arith.mulf %23, %41 : vector<8x256xf32>
    %c239_i32 = arith.constant 239 : i32
    %43 = tpu.dynamic_rotate %42 by %c239_i32 dim 1 : vector<8x256xf32>, i32 -> vector<8x256xf32>
    %44 = tpu.concatenate %26, %29, %32, %33, %14, %34, %37, %40, %43 in 0 : vector<8x256xf32>, vector<8x256xf32>, vector<8x256xf32>, vector<8x256xf32>, vector<8x256xf32>, vector<8x256xf32>, vector<8x256xf32>, vector<8x256xf32>, vector<8x256xf32> -> vector<72x256xf32>
    %c0_14 = arith.constant 0 : index
    %c0_15 = arith.constant 0 : index
    %45 = vector.load %arg6[%c0_14, %c0_15] : memref<8x72xf32, #tpu.memory_space<vmem>>, vector<8x72xf32>
    %cst_16 = arith.constant dense<0.000000e+00> : vector<8x256xf32>
    %46 = tpu.matmul %45, %44, %cst_16 {dimension_numbers = #tpu.dot_dimension_numbers<[1], [0], [0], [1], [0, 0, 1, 1], [], []>} : vector<8x72xf32>, vector<72x256xf32>, vector<8x256xf32> -> vector<8x256xf32>
    %c0_17 = arith.constant 0 : index
    %c0_18 = arith.constant 0 : index
    %c0_19 = arith.constant 0 : index
    %47 = vector.load %arg8[%c0_17, %c0_18, %c0_19] : memref<1x8x256xf32, #tpu.memory_space<vmem>>, vector<1x8x256xf32>
    %48 = vector.shape_cast %47 : vector<1x8x256xf32> to vector<8x256xf32>
    %49 = vector.shape_cast %46 : vector<8x256xf32> to vector<1x8x256xf32>
    tpu.vector_store %arg8[%c0_17, %c0_18, %c0_19], %49 {strides = array<i32>} : memref<1x8x256xf32, #tpu.memory_space<vmem>>, vector<1x8x256xf32>,
    return
  }
  func.func @transform_0(%arg0: i32) -> (i32, i32, i32) {
    %c0_i32 = arith.constant 0 : i32
    %c0_i32_0 = arith.constant 0 : i32
    %c0_i32_1 = arith.constant 0 : i32
    return %arg0, %c0_i32, %c0_i32_0 : i32, i32, i32
  }
  func.func @transform_1(%arg0: i32) -> (i32, i32) {
    %c0_i32 = arith.constant 0 : i32
    %c0_i32_0 = arith.constant 0 : i32
    %c0_i32_1 = arith.constant 0 : i32
    return %c0_i32, %c0_i32_0 : i32, i32
  }
  func.func @transform_2(%arg0: i32) -> (i32, i32, i32) {
    %c0_i32 = arith.constant 0 : i32
    %c0_i32_0 = arith.constant 0 : i32
    %c0_i32_1 = arith.constant 0 : i32
    return %arg0, %c0_i32, %c0_i32_0 : i32, i32, i32
  }
  func.func @transform_3(%arg0: i32) -> (i32, i32) {
    %c0_i32 = arith.constant 0 : i32
    %c0_i32_0 = arith.constant 0 : i32
    %c0_i32_1 = arith.constant 0 : i32
    return %c0_i32, %c0_i32_0 : i32, i32
  }
  func.func @transform_4(%arg0: i32) -> (i32, i32) {
    %c0_i32 = arith.constant 0 : i32
    %c0_i32_0 = arith.constant 0 : i32
    %c0_i32_1 = arith.constant 0 : i32
    return %c0_i32, %c0_i32_0 : i32, i32
  }
  func.func @transform_5(%arg0: i32) -> (i32, i32) {
    %c0_i32 = arith.constant 0 : i32
    %c0_i32_0 = arith.constant 0 : i32
    %c0_i32_1 = arith.constant 0 : i32
    return %c0_i32, %c0_i32_0 : i32, i32
  }
  func.func @transform_6(%arg0: i32) -> (i32, i32) {
    %c0_i32 = arith.constant 0 : i32
    %c0_i32_0 = arith.constant 0 : i32
    %c0_i32_1 = arith.constant 0 : i32
    return %c0_i32, %c0_i32_0 : i32, i32
  }
  func.func @transform_7(%arg0: i32) -> (i32, i32, i32) {
    %c0_i32 = arith.constant 0 : i32
    %c0_i32_0 = arith.constant 0 : i32
    %c0_i32_1 = arith.constant 0 : i32
    return %arg0, %c0_i32, %c0_i32_0 : i32, i32, i32
  }
}

module attributes {stable_mosaic.version = 11 : i64} {
  func.func @_process_kernel(%arg0: i32, %arg1: memref<1x8x16xf32, #tpu.memory_space<vmem>>, %arg2: memref<16x256xf32, #tpu.memory_space<vmem>>, %arg3: memref<1x8x256xf32, #tpu.memory_space<vmem>>, %arg4: memref<8x1xf32, #tpu.memory_space<vmem>>, %arg5: memref<8x1xf32, #tpu.memory_space<vmem>>, %arg6: memref<8x72xf32, #tpu.memory_space<vmem>>, %arg7: memref<4x256xf32, #tpu.memory_space<vmem>>, %arg8: memref<1x8x256xf32, #tpu.memory_space<vmem>>) attributes {dimension_semantics = [#tpu.dimension_semantics<parallel>], iteration_bounds = array<i64: 2>, scalar_prefetch = 0 : i64, scratch_operands = 0 : i64, tpu.core_type = #tpu.core_type<tc>, window_params = [{transform_indices = @transform_0, window_bounds = array<i64: 1, 8, 16>}, {pipeline_mode = #tpu.pipeline_mode<synchronous>, transform_indices = @transform_1, window_bounds = array<i64: 16, 256>}, {transform_indices = @transform_2, window_bounds = array<i64: 1, 8, 256>}, {pipeline_mode = #tpu.pipeline_mode<synchronous>, transform_indices = @transform_3, window_bounds = array<i64: 8, 1>}, {pipeline_mode = #tpu.pipeline_mode<synchronous>, transform_indices = @transform_4, window_bounds = array<i64: 8, 1>}, {pipeline_mode = #tpu.pipeline_mode<synchronous>, transform_indices = @transform_5, window_bounds = array<i64: 8, 72>}, {pipeline_mode = #tpu.pipeline_mode<synchronous>, transform_indices = @transform_6, window_bounds = array<i64: 4, 256>}, {transform_indices = @transform_7, window_bounds = array<i64: 1, 8, 256>}]} {
    %c0 = arith.constant 0 : index
    %c0_0 = arith.constant 0 : index
    %c0_1 = arith.constant 0 : index
    %0 = vector.load %arg1[%c0, %c0_0, %c0_1] : memref<1x8x16xf32, #tpu.memory_space<vmem>>, vector<1x8x16xf32>
    %1 = vector.shape_cast %0 : vector<1x8x16xf32> to vector<8x16xf32>
    %c0_2 = arith.constant 0 : index
    %c0_3 = arith.constant 0 : index
    %2 = vector.load %arg2[%c0_2, %c0_3] : memref<16x256xf32, #tpu.memory_space<vmem>>, vector<16x256xf32>
    %cst = arith.constant dense<0.000000e+00> : vector<8x256xf32>
    %3 = tpu.matmul %1, %2, %cst {dimension_numbers = #tpu.dot_dimension_numbers<[1], [0], [0], [1], [0, 0, 1, 1], [], []>} : vector<8x16xf32>, vector<16x256xf32>, vector<8x256xf32> -> vector<8x256xf32>
    %c0_4 = arith.constant 0 : index
    %c0_5 = arith.constant 0 : index
    %c0_6 = arith.constant 0 : index
    %4 = vector.load %arg3[%c0_4, %c0_5, %c0_6] : memref<1x8x256xf32, #tpu.memory_space<vmem>>, vector<1x8x256xf32>
    %5 = vector.shape_cast %4 : vector<1x8x256xf32> to vector<8x256xf32>
    %6 = arith.addf %3, %5 : vector<8x256xf32>
    %c0_7 = arith.constant 0 : index
    %c0_8 = arith.constant 0 : index
    %7 = vector.load %arg4[%c0_7, %c0_8] : memref<8x1xf32, #tpu.memory_space<vmem>>, vector<8x1xf32>
    %8 = vector.broadcast %7 : vector<8x1xf32> to vector<8x256xf32>
    %9 = arith.mulf %6, %8 : vector<8x256xf32>
    %c0_9 = arith.constant 0 : index
    %c0_10 = arith.constant 0 : index
    %10 = vector.load %arg5[%c0_9, %c0_10] : memref<8x1xf32, #tpu.memory_space<vmem>>, vector<8x1xf32>
    %11 = vector.broadcast %10 : vector<8x1xf32> to vector<8x256xf32>
    %12 = arith.addf %9, %11 : vector<8x256xf32>
    %cst_11 = arith.constant 0.000000e+00 : f32
    %13 = vector.broadcast %cst_11 : f32 to vector<8x256xf32>
    %14 = arith.maximumf %12, %13 : vector<8x256xf32>
    %c0_12 = arith.constant 0 : index
    %c0_13 = arith.constant 0 : index
    %15 = vector.load %arg7[%c0_12, %c0_13] : memref<4x256xf32, #tpu.memory_space<vmem>>, vector<4x256xf32>
    %16 = vector.extract_strided_slice %15 {offsets = [0, 0], sizes = [1, 256], strides = [1, 1]} : vector<4x256xf32> to vector<1x256xf32>
    %17 = vector.extract_strided_slice %15 {offsets = [1, 0], sizes = [1, 256], strides = [1, 1]} : vector<4x256xf32> to vector<1x256xf32>
    %18 = vector.extract_strided_slice %15 {offsets = [2, 0], sizes = [1, 256], strides = [1, 1]} : vector<4x256xf32> to vector<1x256xf32>
    %19 = vector.broadcast %18 : vector<1x256xf32> to vector<8x256xf32>
    %20 = arith.mulf %14, %19 : vector<8x256xf32>
    %21 = vector.extract_strided_slice %15 {offsets = [3, 0], sizes = [1, 256], strides = [1, 1]} : vector<4x256xf32> to vector<1x256xf32>
    %22 = vector.broadcast %21 : vector<1x256xf32> to vector<8x256xf32>
    %23 = arith.mulf %14, %22 : vector<8x256xf32>
    %24 = vector.broadcast %16 : vector<1x256xf32> to vector<8x256xf32>
    %25 = arith.mulf %20, %24 : vector<8x256xf32>
    %c17_i32 = arith.constant 17 : i32
    %26 = tpu.dynamic_rotate %25 by %c17_i32 dim 1 : vector<8x256xf32>, i32 -> vector<8x256xf32>
    %27 = vector.broadcast %16 : vector<1x256xf32> to vector<8x256xf32>
    %28 = arith.mulf %14, %27 : vector<8x256xf32>
    %c16_i32 = arith.constant 16 : i32
    %29 = tpu.dynamic_rotate %28 by %c16_i32 dim 1 : vector<8x256xf32>, i32 -> vector<8x256xf32>
    %30 = vector.broadcast %16 : vector<1x256xf32> to vector<8x256xf32>
    %31 = arith.mulf %23, %30 : vector<8x256xf32>
    %c15_i32 = arith.constant 15 : i32
    %32 = tpu.dynamic_rotate %31 by %c15_i32 dim 1 : vector<8x256xf32>, i32 -> vector<8x256xf32>
    %c1_i32 = arith.constant 1 : i32
    %33 = tpu.dynamic_rotate %20 by %c1_i32 dim 1 : vector<8x256xf32>, i32 -> vector<8x256xf32>
    %c255_i32 = arith.constant 255 : i32
    %34 = tpu.dynamic_rotate %23 by %c255_i32 dim 1 : vector<8x256xf32>, i32 -> vector<8x256xf32>
    %35 = vector.broadcast %17 : vector<1x256xf32> to vector<8x256xf32>
    %36 = arith.mulf %20, %35 : vector<8x256xf32>
    %c241_i32 = arith.constant 241 : i32
    %37 = tpu.dynamic_rotate %36 by %c241_i32 dim 1 : vector<8x256xf32>, i32 -> vector<8x256xf32>
    %38 = vector.broadcast %17 : vector<1x256xf32> to vector<8x256xf32>
    %39 = arith.mulf %14, %38 : vector<8x256xf32>
    %c240_i32 = arith.constant 240 : i32
    %40 = tpu.dynamic_rotate %39 by %c240_i32 dim 1 : vector<8x256xf32>, i32 -> vector<8x256xf32>
    %41 = vector.broadcast %17 : vector<1x256xf32> to vector<8x256xf32>
    %42 = arith.mulf %23, %41 : vector<8x256xf32>
    %c239_i32 = arith.constant 239 : i32
    %43 = tpu.dynamic_rotate %42 by %c239_i32 dim 1 : vector<8x256xf32>, i32 -> vector<8x256xf32>
    %44 = tpu.concatenate %26, %29, %32, %33, %14, %34, %37, %40, %43 in 0 : vector<8x256xf32>, vector<8x256xf32>, vector<8x256xf32>, vector<8x256xf32>, vector<8x256xf32>, vector<8x256xf32>, vector<8x256xf32>, vector<8x256xf32>, vector<8x256xf32> -> vector<72x256xf32>
    %c0_14 = arith.constant 0 : index
    %c0_15 = arith.constant 0 : index
    %45 = vector.load %arg6[%c0_14, %c0_15] : memref<8x72xf32, #tpu.memory_space<vmem>>, vector<8x72xf32>
    %cst_16 = arith.constant dense<0.000000e+00> : vector<8x256xf32>
    %46 = tpu.matmul %45, %44, %cst_16 {dimension_numbers = #tpu.dot_dimension_numbers<[1], [0], [0], [1], [0, 0, 1, 1], [], []>} : vector<8x72xf32>, vector<72x256xf32>, vector<8x256xf32> -> vector<8x256xf32>
    %c0_17 = arith.constant 0 : index
    %c0_18 = arith.constant 0 : index
    %c0_19 = arith.constant 0 : index
    %47 = vector.load %arg8[%c0_17, %c0_18, %c0_19] : memref<1x8x256xf32, #tpu.memory_space<vmem>>, vector<1x8x256xf32>
    %48 = vector.shape_cast %47 : vector<1x8x256xf32> to vector<8x256xf32>
    %49 = vector.shape_cast %46 : vector<8x256xf32> to vector<1x8x256xf32>
    tpu.vector_store %arg8[%c0_17, %c0_18, %c0_19], %49 {strides = array<i32>} : memref<1x8x256xf32, #tpu.memory_space<vmem>>, vector<1x8x256xf32>,
    return
  }
  func.func @transform_0(%arg0: i32) -> (i32, i32, i32) {
    %c0_i32 = arith.constant 0 : i32
    %c0_i32_0 = arith.constant 0 : i32
    %c0_i32_1 = arith.constant 0 : i32
    return %arg0, %c0_i32, %c0_i32_0 : i32, i32, i32
  }
  func.func @transform_1(%arg0: i32) -> (i32, i32) {
    %c0_i32 = arith.constant 0 : i32
    %c0_i32_0 = arith.constant 0 : i32
    %c0_i32_1 = arith.constant 0 : i32
    return %c0_i32, %c0_i32_0 : i32, i32
  }
  func.func @transform_2(%arg0: i32) -> (i32, i32, i32) {
    %c0_i32 = arith.constant 0 : i32
    %c0_i32_0 = arith.constant 0 : i32
    %c0_i32_1 = arith.constant 0 : i32
    return %arg0, %c0_i32, %c0_i32_0 : i32, i32, i32
  }
  func.func @transform_3(%arg0: i32) -> (i32, i32) {
    %c0_i32 = arith.constant 0 : i32
    %c0_i32_0 = arith.constant 0 : i32
    %c0_i32_1 = arith.constant 0 : i32
    return %c0_i32, %c0_i32_0 : i32, i32
  }
  func.func @transform_4(%arg0: i32) -> (i32, i32) {
    %c0_i32 = arith.constant 0 : i32
    %c0_i32_0 = arith.constant 0 : i32
    %c0_i32_1 = arith.constant 0 : i32
    return %c0_i32, %c0_i32_0 : i32, i32
  }
  func.func @transform_5(%arg0: i32) -> (i32, i32) {
    %c0_i32 = arith.constant 0 : i32
    %c0_i32_0 = arith.constant 0 : i32
    %c0_i32_1 = arith.constant 0 : i32
    return %c0_i32, %c0_i32_0 : i32, i32
  }
  func.func @transform_6(%arg0: i32) -> (i32, i32) {
    %c0_i32 = arith.constant 0 : i32
    %c0_i32_0 = arith.constant 0 : i32
    %c0_i32_1 = arith.constant 0 : i32
    return %c0_i32, %c0_i32_0 : i32, i32
  }
  func.func @transform_7(%arg0: i32) -> (i32, i32, i32) {
    %c0_i32 = arith.constant 0 : i32
    %c0_i32_0 = arith.constant 0 : i32
    %c0_i32_1 = arith.constant 0 : i32
    return %arg0, %c0_i32, %c0_i32_0 : i32, i32, i32
  }
}

module attributes {stable_mosaic.version = 11 : i64} {
  func.func @_process_kernel(%arg0: i32, %arg1: memref<1x8x8xf32, #tpu.memory_space<vmem>>, %arg2: memref<8x256xf32, #tpu.memory_space<vmem>>, %arg3: memref<1x8x256xf32, #tpu.memory_space<vmem>>, %arg4: memref<8x1xf32, #tpu.memory_space<vmem>>, %arg5: memref<8x1xf32, #tpu.memory_space<vmem>>, %arg6: memref<8x72xf32, #tpu.memory_space<vmem>>, %arg7: memref<4x256xf32, #tpu.memory_space<vmem>>, %arg8: memref<1x8x256xf32, #tpu.memory_space<vmem>>) attributes {dimension_semantics = [#tpu.dimension_semantics<parallel>], iteration_bounds = array<i64: 2>, scalar_prefetch = 0 : i64, scratch_operands = 0 : i64, tpu.core_type = #tpu.core_type<tc>, window_params = [{transform_indices = @transform_0, window_bounds = array<i64: 1, 8, 8>}, {pipeline_mode = #tpu.pipeline_mode<synchronous>, transform_indices = @transform_1, window_bounds = array<i64: 8, 256>}, {transform_indices = @transform_2, window_bounds = array<i64: 1, 8, 256>}, {pipeline_mode = #tpu.pipeline_mode<synchronous>, transform_indices = @transform_3, window_bounds = array<i64: 8, 1>}, {pipeline_mode = #tpu.pipeline_mode<synchronous>, transform_indices = @transform_4, window_bounds = array<i64: 8, 1>}, {pipeline_mode = #tpu.pipeline_mode<synchronous>, transform_indices = @transform_5, window_bounds = array<i64: 8, 72>}, {pipeline_mode = #tpu.pipeline_mode<synchronous>, transform_indices = @transform_6, window_bounds = array<i64: 4, 256>}, {transform_indices = @transform_7, window_bounds = array<i64: 1, 8, 256>}]} {
    %c0 = arith.constant 0 : index
    %c0_0 = arith.constant 0 : index
    %c0_1 = arith.constant 0 : index
    %0 = vector.load %arg1[%c0, %c0_0, %c0_1] : memref<1x8x8xf32, #tpu.memory_space<vmem>>, vector<1x8x8xf32>
    %1 = vector.shape_cast %0 : vector<1x8x8xf32> to vector<8x8xf32>
    %c0_2 = arith.constant 0 : index
    %c0_3 = arith.constant 0 : index
    %2 = vector.load %arg2[%c0_2, %c0_3] : memref<8x256xf32, #tpu.memory_space<vmem>>, vector<8x256xf32>
    %cst = arith.constant dense<0.000000e+00> : vector<8x256xf32>
    %3 = tpu.matmul %1, %2, %cst {dimension_numbers = #tpu.dot_dimension_numbers<[1], [0], [0], [1], [0, 0, 1, 1], [], []>} : vector<8x8xf32>, vector<8x256xf32>, vector<8x256xf32> -> vector<8x256xf32>
    %c0_4 = arith.constant 0 : index
    %c0_5 = arith.constant 0 : index
    %c0_6 = arith.constant 0 : index
    %4 = vector.load %arg3[%c0_4, %c0_5, %c0_6] : memref<1x8x256xf32, #tpu.memory_space<vmem>>, vector<1x8x256xf32>
    %5 = vector.shape_cast %4 : vector<1x8x256xf32> to vector<8x256xf32>
    %6 = arith.addf %3, %5 : vector<8x256xf32>
    %c0_7 = arith.constant 0 : index
    %c0_8 = arith.constant 0 : index
    %7 = vector.load %arg4[%c0_7, %c0_8] : memref<8x1xf32, #tpu.memory_space<vmem>>, vector<8x1xf32>
    %8 = vector.broadcast %7 : vector<8x1xf32> to vector<8x256xf32>
    %9 = arith.mulf %6, %8 : vector<8x256xf32>
    %c0_9 = arith.constant 0 : index
    %c0_10 = arith.constant 0 : index
    %10 = vector.load %arg5[%c0_9, %c0_10] : memref<8x1xf32, #tpu.memory_space<vmem>>, vector<8x1xf32>
    %11 = vector.broadcast %10 : vector<8x1xf32> to vector<8x256xf32>
    %12 = arith.addf %9, %11 : vector<8x256xf32>
    %cst_11 = arith.constant 0.000000e+00 : f32
    %13 = vector.broadcast %cst_11 : f32 to vector<8x256xf32>
    %14 = arith.maximumf %12, %13 : vector<8x256xf32>
    %c0_12 = arith.constant 0 : index
    %c0_13 = arith.constant 0 : index
    %15 = vector.load %arg7[%c0_12, %c0_13] : memref<4x256xf32, #tpu.memory_space<vmem>>, vector<4x256xf32>
    %16 = vector.extract_strided_slice %15 {offsets = [0, 0], sizes = [1, 256], strides = [1, 1]} : vector<4x256xf32> to vector<1x256xf32>
    %17 = vector.extract_strided_slice %15 {offsets = [1, 0], sizes = [1, 256], strides = [1, 1]} : vector<4x256xf32> to vector<1x256xf32>
    %18 = vector.extract_strided_slice %15 {offsets = [2, 0], sizes = [1, 256], strides = [1, 1]} : vector<4x256xf32> to vector<1x256xf32>
    %19 = vector.broadcast %18 : vector<1x256xf32> to vector<8x256xf32>
    %20 = arith.mulf %14, %19 : vector<8x256xf32>
    %21 = vector.extract_strided_slice %15 {offsets = [3, 0], sizes = [1, 256], strides = [1, 1]} : vector<4x256xf32> to vector<1x256xf32>
    %22 = vector.broadcast %21 : vector<1x256xf32> to vector<8x256xf32>
    %23 = arith.mulf %14, %22 : vector<8x256xf32>
    %24 = vector.broadcast %16 : vector<1x256xf32> to vector<8x256xf32>
    %25 = arith.mulf %20, %24 : vector<8x256xf32>
    %c17_i32 = arith.constant 17 : i32
    %26 = tpu.dynamic_rotate %25 by %c17_i32 dim 1 : vector<8x256xf32>, i32 -> vector<8x256xf32>
    %27 = vector.broadcast %16 : vector<1x256xf32> to vector<8x256xf32>
    %28 = arith.mulf %14, %27 : vector<8x256xf32>
    %c16_i32 = arith.constant 16 : i32
    %29 = tpu.dynamic_rotate %28 by %c16_i32 dim 1 : vector<8x256xf32>, i32 -> vector<8x256xf32>
    %30 = vector.broadcast %16 : vector<1x256xf32> to vector<8x256xf32>
    %31 = arith.mulf %23, %30 : vector<8x256xf32>
    %c15_i32 = arith.constant 15 : i32
    %32 = tpu.dynamic_rotate %31 by %c15_i32 dim 1 : vector<8x256xf32>, i32 -> vector<8x256xf32>
    %c1_i32 = arith.constant 1 : i32
    %33 = tpu.dynamic_rotate %20 by %c1_i32 dim 1 : vector<8x256xf32>, i32 -> vector<8x256xf32>
    %c255_i32 = arith.constant 255 : i32
    %34 = tpu.dynamic_rotate %23 by %c255_i32 dim 1 : vector<8x256xf32>, i32 -> vector<8x256xf32>
    %35 = vector.broadcast %17 : vector<1x256xf32> to vector<8x256xf32>
    %36 = arith.mulf %20, %35 : vector<8x256xf32>
    %c241_i32 = arith.constant 241 : i32
    %37 = tpu.dynamic_rotate %36 by %c241_i32 dim 1 : vector<8x256xf32>, i32 -> vector<8x256xf32>
    %38 = vector.broadcast %17 : vector<1x256xf32> to vector<8x256xf32>
    %39 = arith.mulf %14, %38 : vector<8x256xf32>
    %c240_i32 = arith.constant 240 : i32
    %40 = tpu.dynamic_rotate %39 by %c240_i32 dim 1 : vector<8x256xf32>, i32 -> vector<8x256xf32>
    %41 = vector.broadcast %17 : vector<1x256xf32> to vector<8x256xf32>
    %42 = arith.mulf %23, %41 : vector<8x256xf32>
    %c239_i32 = arith.constant 239 : i32
    %43 = tpu.dynamic_rotate %42 by %c239_i32 dim 1 : vector<8x256xf32>, i32 -> vector<8x256xf32>
    %44 = tpu.concatenate %26, %29, %32, %33, %14, %34, %37, %40, %43 in 0 : vector<8x256xf32>, vector<8x256xf32>, vector<8x256xf32>, vector<8x256xf32>, vector<8x256xf32>, vector<8x256xf32>, vector<8x256xf32>, vector<8x256xf32>, vector<8x256xf32> -> vector<72x256xf32>
    %c0_14 = arith.constant 0 : index
    %c0_15 = arith.constant 0 : index
    %45 = vector.load %arg6[%c0_14, %c0_15] : memref<8x72xf32, #tpu.memory_space<vmem>>, vector<8x72xf32>
    %cst_16 = arith.constant dense<0.000000e+00> : vector<8x256xf32>
    %46 = tpu.matmul %45, %44, %cst_16 {dimension_numbers = #tpu.dot_dimension_numbers<[1], [0], [0], [1], [0, 0, 1, 1], [], []>} : vector<8x72xf32>, vector<72x256xf32>, vector<8x256xf32> -> vector<8x256xf32>
    %c0_17 = arith.constant 0 : index
    %c0_18 = arith.constant 0 : index
    %c0_19 = arith.constant 0 : index
    %47 = vector.load %arg8[%c0_17, %c0_18, %c0_19] : memref<1x8x256xf32, #tpu.memory_space<vmem>>, vector<1x8x256xf32>
    %48 = vector.shape_cast %47 : vector<1x8x256xf32> to vector<8x256xf32>
    %49 = vector.shape_cast %46 : vector<8x256xf32> to vector<1x8x256xf32>
    tpu.vector_store %arg8[%c0_17, %c0_18, %c0_19], %49 {strides = array<i32>} : memref<1x8x256xf32, #tpu.memory_space<vmem>>, vector<1x8x256xf32>,
    return
  }
  func.func @transform_0(%arg0: i32) -> (i32, i32, i32) {
    %c0_i32 = arith.constant 0 : i32
    %c0_i32_0 = arith.constant 0 : i32
    %c0_i32_1 = arith.constant 0 : i32
    return %arg0, %c0_i32, %c0_i32_0 : i32, i32, i32
  }
  func.func @transform_1(%arg0: i32) -> (i32, i32) {
    %c0_i32 = arith.constant 0 : i32
    %c0_i32_0 = arith.constant 0 : i32
    %c0_i32_1 = arith.constant 0 : i32
    return %c0_i32, %c0_i32_0 : i32, i32
  }
  func.func @transform_2(%arg0: i32) -> (i32, i32, i32) {
    %c0_i32 = arith.constant 0 : i32
    %c0_i32_0 = arith.constant 0 : i32
    %c0_i32_1 = arith.constant 0 : i32
    return %arg0, %c0_i32, %c0_i32_0 : i32, i32, i32
  }
  func.func @transform_3(%arg0: i32) -> (i32, i32) {
    %c0_i32 = arith.constant 0 : i32
    %c0_i32_0 = arith.constant 0 : i32
    %c0_i32_1 = arith.constant 0 : i32
    return %c0_i32, %c0_i32_0 : i32, i32
  }
  func.func @transform_4(%arg0: i32) -> (i32, i32) {
    %c0_i32 = arith.constant 0 : i32
    %c0_i32_0 = arith.constant 0 : i32
    %c0_i32_1 = arith.constant 0 : i32
    return %c0_i32, %c0_i32_0 : i32, i32
  }
  func.func @transform_5(%arg0: i32) -> (i32, i32) {
    %c0_i32 = arith.constant 0 : i32
    %c0_i32_0 = arith.constant 0 : i32
    %c0_i32_1 = arith.constant 0 : i32
    return %c0_i32, %c0_i32_0 : i32, i32
  }
  func.func @transform_6(%arg0: i32) -> (i32, i32) {
    %c0_i32 = arith.constant 0 : i32
    %c0_i32_0 = arith.constant 0 : i32
    %c0_i32_1 = arith.constant 0 : i32
    return %c0_i32, %c0_i32_0 : i32, i32
  }
  func.func @transform_7(%arg0: i32) -> (i32, i32, i32) {
    %c0_i32 = arith.constant 0 : i32
    %c0_i32_0 = arith.constant 0 : i32
    %c0_i32_1 = arith.constant 0 : i32
    return %arg0, %c0_i32, %c0_i32_0 : i32, i32, i32
  }
}

module attributes {stable_mosaic.version = 11 : i64} {
  func.func @_compress_shortcut_kernel(%arg0: i32, %arg1: i32, %arg2: memref<56x1xf32, #tpu.memory_space<vmem>>, %arg3: memref<56x1xf32, #tpu.memory_space<vmem>>, %arg4: memref<16x56xf32, #tpu.memory_space<vmem>>, %arg5: memref<1x8x256xf32, #tpu.memory_space<vmem>>, %arg6: memref<1x8x256xf32, #tpu.memory_space<vmem>>, %arg7: memref<1x8x256xf32, #tpu.memory_space<vmem>>, %arg8: memref<1x8x256xf32, #tpu.memory_space<vmem>>, %arg9: memref<1x8x256xf32, #tpu.memory_space<vmem>>, %arg10: memref<1x16x256xf32, #tpu.memory_space<vmem>>, %arg11: memref<1x16x256xf32, #tpu.memory_space<vmem>>) attributes {dimension_semantics = [#tpu.dimension_semantics<parallel>, #tpu.dimension_semantics<parallel>], iteration_bounds = array<i64: 2, 1>, scalar_prefetch = 0 : i64, scratch_operands = 0 : i64, tpu.core_type = #tpu.core_type<tc>, window_params = [{pipeline_mode = #tpu.pipeline_mode<synchronous>, transform_indices = @transform_0, window_bounds = array<i64: 56, 1>}, {pipeline_mode = #tpu.pipeline_mode<synchronous>, transform_indices = @transform_1, window_bounds = array<i64: 56, 1>}, {pipeline_mode = #tpu.pipeline_mode<synchronous>, transform_indices = @transform_2, window_bounds = array<i64: 16, 56>}, {transform_indices = @transform_3, window_bounds = array<i64: 1, 8, 256>}, {transform_indices = @transform_4, window_bounds = array<i64: 1, 8, 256>}, {transform_indices = @transform_5, window_bounds = array<i64: 1, 8, 256>}, {transform_indices = @transform_6, window_bounds = array<i64: 1, 8, 256>}, {transform_indices = @transform_7, window_bounds = array<i64: 1, 8, 256>}, {transform_indices = @transform_8, window_bounds = array<i64: 1, 16, 256>}, {transform_indices = @transform_9, window_bounds = array<i64: 1, 16, 256>}]} {
    %c0 = arith.constant 0 : index
    %c0_0 = arith.constant 0 : index
    %c0_1 = arith.constant 0 : index
    %0 = vector.load %arg5[%c0, %c0_0, %c0_1] : memref<1x8x256xf32, #tpu.memory_space<vmem>>, vector<1x8x256xf32>
    %1 = vector.shape_cast %0 : vector<1x8x256xf32> to vector<8x256xf32>
    %c0_2 = arith.constant 0 : index
    %c0_3 = arith.constant 0 : index
    %c0_4 = arith.constant 0 : index
    %2 = vector.load %arg6[%c0_2, %c0_3, %c0_4] : memref<1x8x256xf32, #tpu.memory_space<vmem>>, vector<1x8x256xf32>
    %3 = vector.shape_cast %2 : vector<1x8x256xf32> to vector<8x256xf32>
    %c0_5 = arith.constant 0 : index
    %c0_6 = arith.constant 0 : index
    %c0_7 = arith.constant 0 : index
    %4 = vector.load %arg7[%c0_5, %c0_6, %c0_7] : memref<1x8x256xf32, #tpu.memory_space<vmem>>, vector<1x8x256xf32>
    %5 = vector.shape_cast %4 : vector<1x8x256xf32> to vector<8x256xf32>
    %c0_8 = arith.constant 0 : index
    %c0_9 = arith.constant 0 : index
    %c0_10 = arith.constant 0 : index
    %6 = vector.load %arg8[%c0_8, %c0_9, %c0_10] : memref<1x8x256xf32, #tpu.memory_space<vmem>>, vector<1x8x256xf32>
    %7 = vector.shape_cast %6 : vector<1x8x256xf32> to vector<8x256xf32>
    %c0_11 = arith.constant 0 : index
    %c0_12 = arith.constant 0 : index
    %c0_13 = arith.constant 0 : index
    %8 = vector.load %arg9[%c0_11, %c0_12, %c0_13] : memref<1x8x256xf32, #tpu.memory_space<vmem>>, vector<1x8x256xf32>
    %9 = vector.shape_cast %8 : vector<1x8x256xf32> to vector<8x256xf32>
    %c0_14 = arith.constant 0 : index
    %c0_15 = arith.constant 0 : index
    %c0_16 = arith.constant 0 : index
    %10 = vector.load %arg10[%c0_14, %c0_15, %c0_16] : memref<1x16x256xf32, #tpu.memory_space<vmem>>, vector<1x16x256xf32>
    %11 = vector.shape_cast %10 : vector<1x16x256xf32> to vector<16x256xf32>
    %12 = tpu.concatenate %1, %3, %5, %7, %9, %11 in 0 : vector<8x256xf32>, vector<8x256xf32>, vector<8x256xf32>, vector<8x256xf32>, vector<8x256xf32>, vector<16x256xf32> -> vector<56x256xf32>
    %c0_17 = arith.constant 0 : index
    %c0_18 = arith.constant 0 : index
    %13 = vector.load %arg2[%c0_17, %c0_18] : memref<56x1xf32, #tpu.memory_space<vmem>>, vector<56x1xf32>
    %14 = vector.broadcast %13 : vector<56x1xf32> to vector<56x256xf32>
    %15 = arith.mulf %12, %14 : vector<56x256xf32>
    %c0_19 = arith.constant 0 : index
    %c0_20 = arith.constant 0 : index
    %16 = vector.load %arg3[%c0_19, %c0_20] : memref<56x1xf32, #tpu.memory_space<vmem>>, vector<56x1xf32>
    %17 = vector.broadcast %16 : vector<56x1xf32> to vector<56x256xf32>
    %18 = arith.addf %15, %17 : vector<56x256xf32>
    %cst = arith.constant 0.000000e+00 : f32
    %19 = vector.broadcast %cst : f32 to vector<56x256xf32>
    %20 = arith.maximumf %18, %19 : vector<56x256xf32>
    %c0_21 = arith.constant 0 : index
    %c0_22 = arith.constant 0 : index
    %21 = vector.load %arg4[%c0_21, %c0_22] : memref<16x56xf32, #tpu.memory_space<vmem>>, vector<16x56xf32>
    %cst_23 = arith.constant dense<0.000000e+00> : vector<16x256xf32>
    %22 = tpu.matmul %21, %20, %cst_23 {dimension_numbers = #tpu.dot_dimension_numbers<[1], [0], [0], [1], [0, 0, 1, 1], [], []>} : vector<16x56xf32>, vector<56x256xf32>, vector<16x256xf32> -> vector<16x256xf32>
    %c0_24 = arith.constant 0 : index
    %c0_25 = arith.constant 0 : index
    %c0_26 = arith.constant 0 : index
    %23 = vector.load %arg11[%c0_24, %c0_25, %c0_26] : memref<1x16x256xf32, #tpu.memory_space<vmem>>, vector<1x16x256xf32>
    %24 = vector.shape_cast %23 : vector<1x16x256xf32> to vector<16x256xf32>
    %25 = vector.shape_cast %22 : vector<16x256xf32> to vector<1x16x256xf32>
    tpu.vector_store %arg11[%c0_24, %c0_25, %c0_26], %25 {strides = array<i32>} : memref<1x16x256xf32, #tpu.memory_space<vmem>>, vector<1x16x256xf32>,
    return
  }
  func.func @transform_0(%arg0: i32, %arg1: i32) -> (i32, i32) {
    %c0_i32 = arith.constant 0 : i32
    %c0_i32_0 = arith.constant 0 : i32
    %c0_i32_1 = arith.constant 0 : i32
    return %c0_i32, %c0_i32_0 : i32, i32
  }
  func.func @transform_1(%arg0: i32, %arg1: i32) -> (i32, i32) {
    %c0_i32 = arith.constant 0 : i32
    %c0_i32_0 = arith.constant 0 : i32
    %c0_i32_1 = arith.constant 0 : i32
    return %c0_i32, %c0_i32_0 : i32, i32
  }
  func.func @transform_2(%arg0: i32, %arg1: i32) -> (i32, i32) {
    %c0_i32 = arith.constant 0 : i32
    %c0_i32_0 = arith.constant 0 : i32
    %c0_i32_1 = arith.constant 0 : i32
    return %c0_i32, %c0_i32_0 : i32, i32
  }
  func.func @transform_3(%arg0: i32, %arg1: i32) -> (i32, i32, i32) {
    %c0_i32 = arith.constant 0 : i32
    %c0_i32_0 = arith.constant 0 : i32
    return %arg0, %c0_i32, %arg1 : i32, i32, i32
  }
  func.func @transform_4(%arg0: i32, %arg1: i32) -> (i32, i32, i32) {
    %c0_i32 = arith.constant 0 : i32
    %c0_i32_0 = arith.constant 0 : i32
    return %arg0, %c0_i32, %arg1 : i32, i32, i32
  }
  func.func @transform_5(%arg0: i32, %arg1: i32) -> (i32, i32, i32) {
    %c0_i32 = arith.constant 0 : i32
    %c0_i32_0 = arith.constant 0 : i32
    return %arg0, %c0_i32, %arg1 : i32, i32, i32
  }
  func.func @transform_6(%arg0: i32, %arg1: i32) -> (i32, i32, i32) {
    %c0_i32 = arith.constant 0 : i32
    %c0_i32_0 = arith.constant 0 : i32
    return %arg0, %c0_i32, %arg1 : i32, i32, i32
  }
  func.func @transform_7(%arg0: i32, %arg1: i32) -> (i32, i32, i32) {
    %c0_i32 = arith.constant 0 : i32
    %c0_i32_0 = arith.constant 0 : i32
    return %arg0, %c0_i32, %arg1 : i32, i32, i32
  }
  func.func @transform_8(%arg0: i32, %arg1: i32) -> (i32, i32, i32) {
    %c0_i32 = arith.constant 0 : i32
    %c0_i32_0 = arith.constant 0 : i32
    return %arg0, %c0_i32, %arg1 : i32, i32, i32
  }
  func.func @transform_9(%arg0: i32, %arg1: i32) -> (i32, i32, i32) {
    %c0_i32 = arith.constant 0 : i32
    %c0_i32_0 = arith.constant 0 : i32
    return %arg0, %c0_i32, %arg1 : i32, i32, i32
  }
}

</mosaic_0001>

<bundles_post_ra>
// kernel: dappm_forward.6
= control target key start
LH: loop header
LB: loop body
LE: loop exit
PB: predicated region body
PF: predicated region fallthrough
CT: control target
= control target key end

     0   :  { %s539_s15 = smov 0   ;;  %s541_s16 = smov 0   ;;  %s591_s0 = inlined_call_operand.vmem [shape: f32[16,1], index: 0, kind: input, shape index: {}]   ;;  %s592_s1 = inlined_call_operand.vmem [shape: f32[16,1], index: 1, kind: input, shape index: {}]   ;;  %s593_s2 = inlined_call_operand.vmem [shape: f32[8,16], index: 2, kind: input, shape index: {}]   ;;  %s594_s3 = inlined_call_operand.vmem [shape: f32[2,16,256], index: 3, kind: input, shape index: {}]   ;;  %s595_s4 = inlined_call_operand.vmem [shape: f32[2,8,256], index: 4, kind: output, shape index: {}]  }
   0x1   :  { %s543_s17 = smov 0  }
   0x2 LB: > { %s26_s18 = sadd.s32 1, %s506_s16  ;;  %p446_p0 = scmp.ge.s32.totalorder %s510_s17, 1  ;;  %s510_s17 = sphi %s543_s17, %s14_s17   ;;  %s506_s16 = sphi %s541_s16, %s597_s16   ;;  %s502_s15 = sphi %s539_s15, %s596_s15  }
   0x3   : > { %p28_p1 = scmp.ge.s32.totalorder %s26_s18, 2  ;;  %p183_p2 = scmp.lt.s32.totalorder %s510_s17, 3 }
   0x5   : > { %s599_s18 = smov (%p28_p1, %s26_s18), 0  ;;  %p184_p3 = pnand %p446_p0, %p183_p2 }
   0x6   : > { %v257_v0 = vld [vmem:[%s592_s1] sm:$0xff] (!%p184_p3)  ;;  %v512_v2 = vmov (!%p184_p3), 0   ;;  %v258_v3 = vld [vmem:[%s592_s1 + $0x8] sm:$0xff] (!%p184_p3)  ;;  %v513_v5 = vmov (!%p184_p3), 0.0   ;;  %p218_p4 = scmp.lt.s32.totalorder (!%p184_p3), %s502_s15, 1  ;;  %vm278_vm0 = vcmask (!%p184_p3), 130048  }
   0x7   : > { %187 = sbr.rel (%p184_p3) target bundleno = 366 (0x16e), region = 36  ;;  %v241_v1 = vld [vmem:[%s591_s0] sm:$0xff] (!%p184_p3)  ;;  %487 = vset.pattern.permute.xlu1 (!%p184_p3), %v512_v2  ;;  %486 = vset.pattern.permute.xlu0 (!%p184_p3), %v512_v2  ;;  %v242_v4 = vld [vmem:[%s591_s0 + $0x8] sm:$0xff] (!%p184_p3) }
   0x8   : > { %261 = vperm.xlu1 (!%p184_p3), %487, %v257_v0   ;;  %245 = vperm.xlu0 (!%p184_p3), %486, %v241_v1   ;;  %v277_v28 = vld [vmem:[%s593_s2] sm:$0xff] (!%p184_p3) }
   0x9   : > { %346 = vmatprep.mubr.f32.mxu0 (!%p184_p3), %v513_v5 }
   0xc   : > { %266 = vperm.xlu1 (!%p184_p3), %487, %v258_v3   ;;  %250 = vperm.xlu0 (!%p184_p3), %486, %v242_v4  }
   0xe   : > { %s601_s15 = smov (!%p218_p4, %s502_s15), 1 }
   0xf   : > { %s454_s27 = sshll.u32 %s601_s15, 5  ;;  %s455_s7 = sshll.u32 %s601_s15, 4 }
  0x10   : > { %s225_s30 = scalar_lea.vmem %s594_s3, %s454_s27  ;;  %s235_s10 = scalar_lea.vmem %s595_s4, %s455_s7 }
  0x11   : > { %v237_v6 = vld [vmem:[%s225_s30] sm:$0xff]  ;;  %v238_v7 = vld [vmem:[%s225_s30 + $0x8] sm:$0xff]  ;;  %v239_v12 = vld [vmem:[%s225_s30 + $0x10] sm:$0xff] }
  0x12   : > { %v240_v13 = vld [vmem:[%s225_s30 + $0x18] sm:$0xff] }
  0x87   : > { %v262_v8 = vpop.permute.xlu1 %261  ;;  %v246_v9 = vpop.permute.xlu0 %245 }
  0x88   : > { %v253_v10 = vmul.f32 %v246_v9, %v237_v6  ;;  %v254_v11 = vmul.f32 %v246_v9, %v238_v7 }
  0x8a   : > { %v269_v15 = vadd.f32 %v262_v8, %v253_v10  ;;  %v270_v18 = vadd.f32 %v262_v8, %v254_v11 }
  0x8b   : > { %v251_v14 = vpop.permute.xlu0 %250  ;;  %v267_v19 = vpop.permute.xlu1 %266 }
  0x8c   : > { %v255_v16 = vmul.f32 %v251_v14, %v239_v12  ;;  %v256_v17 = vmul.f32 %v251_v14, %v240_v13  ;;  %v274_v23 = vmax.f32 %v270_v18, 0.0  ;;  %v273_v25 = vmax.f32 %v269_v15, 0.0 }
  0x8e   : > { %v271_v20 = vadd.f32 %v267_v19, %v255_v16  ;;  %v272_v21 = vadd.f32 %v267_v19, %v256_v17 }
  0x90   : > { %v275_v22 = vmax.f32 %v271_v20, 0.0  ;;  %v276_v24 = vmax.f32 %v272_v21, 0.0 }
  0x92   : > { %v456_v26 = vpack.c.bf16 %v276_v24, %v274_v23  ;;  %v458_v27 = vpack.c.bf16 %v275_v22, %v273_v25 }
  0x94   : > { %457 = vmatprep.subr.bf16.mxu0 %v456_v26 }
  0x95   : > { %459 = vmatpush1.bf16.msra.mxu0 %v458_v27 }
  0x98   : > { %451 = vmatmul.mubr.msk.f32.vlgmr.msra.gmra.mrb[0].mxu0 %vm278_vm0, %v277_v28 }
 0x16b   : > { %v348_v29 = vpop.f32.mrb[0].mxu0 }
 0x16c   : > { %353 = vst [vmem:[%s235_s10] sm:$0xff] %v348_v29  ;;  %v350_v30 = vpop.f32.mrb[1].mxu0 }
 0x16d   : > { %354 = vst [vmem:[%s235_s10 + $0x8] sm:$0xff] %v350_v30 }
 0x16e PF: > { %s14_s17 = sadd.s32 1, %s510_s17   ;;  %s596_s15 = smov %s506_s16 }
 0x16f   : > { %p11_p5 = scmp.ge.s32.totalorder %s14_s17, 4   ;;  %s597_s16 = smov %s599_s18 }
 0x171   :  { %13 = sbr.rel (!%p11_p5) target bundleno = 2 (0x2), region = 66 }

// kernel: dappm_forward.7
= control target key start
LH: loop header
LB: loop body
LE: loop exit
PB: predicated region body
PF: predicated region fallthrough
CT: control target
= control target key end

     0   :  { %s861_s24 = smov 0   ;;  %s993_s0 = inlined_call_operand.vmem [shape: f32[2,8,64], index: 0, kind: input, shape index: {}]   ;;  %s994_s1 = inlined_call_operand.vmem [shape: f32[64,256], index: 1, kind: input, shape index: {}]   ;;  %s995_s2 = inlined_call_operand.vmem [shape: f32[2,8,256], index: 2, kind: input, shape index: {}]   ;;  %s996_s3 = inlined_call_operand.vmem [shape: f32[8,1], index: 3, kind: input, shape index: {}]   ;;  %s997_s4 = inlined_call_operand.vmem [shape: f32[8,1], index: 4, kind: input, shape index: {}]   ;;  %s998_s5 = inlined_call_operand.vmem [shape: f32[8,72], index: 5, kind: input, shape index: {}]   ;;  %s999_s6 = inlined_call_operand.vmem [shape: f32[4,256], index: 6, kind: input, shape index: {}]   ;;  %s1000_s7 = inlined_call_operand.vmem [shape: f32[2,8,256], index: 7, kind: output, shape index: {}]  }
   0x1 LB: > { %s701_s25 = sadd.s32 4294967295, %s809_s24   ;;  %p705_p0 = scmp.ge.s32.totalorder %s809_s24, 1  ;;  %s809_s24 = sphi %s861_s24, %s17_s24  }
   0x2   : > { %p246_p1 = scmp.lt.s32.totalorder %s809_s24, 3 }
   0x4   : > { %p247_p2 = pnand %p705_p0, %p246_p1 }
   0x5   : > { %v298_v0 = vld [vmem:[%s994_s1 + $0x8] sm:$0xff] (!%p247_p2)  ;;  %v300_v1 = vld [vmem:[%s994_s1 + $0x18] sm:$0xff] (!%p247_p2)  ;;  %v297_v2 = vld [vmem:[%s994_s1] sm:$0xff] (!%p247_p2)  ;;  %v811_v7 = vmov (!%p247_p2), 0.0   ;;  %p898_p3 = scmp.lt.s32.totalorder (!%p247_p2), %s701_s25, 1  ;;  %v812_v13 = vmov (!%p247_p2), 0   ;;  %v410_v29 = vlaneseq (!%p247_p2) }
   0x6   : > { %250 = sbr.rel (%p247_p2) target bundleno = 605 (0x25d), region = 48  ;;  %v717_v3 = vpack.c.bf16 (!%p247_p2), %v300_v1, %v298_v0  ;;  %v299_v4 = vld [vmem:[%s994_s1 + $0x10] sm:$0xff] (!%p247_p2)  ;;  %v302_v5 = vld [vmem:[%s994_s1 + $0x28] sm:$0xff] (!%p247_p2)  ;;  %v304_v6 = vld [vmem:[%s994_s1 + $0x38] sm:$0xff] (!%p247_p2)  ;;  %383 = vmatprep.mubr.f32.mxu0 (!%p247_p2), %v811_v7  ;;  %625 = vmatprep.mubr.f32.mxu1 (!%p247_p2), %v811_v7  ;;  %vm315_vm0 = vcmask (!%p247_p2), 523264   ;;  %s813_s8 = smov (!%p247_p2), 16  }
   0x7   : > { %v719_v8 = vpack.c.bf16 (!%p247_p2), %v299_v4, %v297_v2  ;;  %v721_v9 = vpack.c.bf16 (!%p247_p2), %v304_v6, %v302_v5  ;;  %v301_v10 = vld [vmem:[%s994_s1 + $0x20] sm:$0xff] (!%p247_p2)  ;;  %v303_v11 = vld [vmem:[%s994_s1 + $0x30] sm:$0xff] (!%p247_p2)  ;;  %v306_v12 = vld [vmem:[%s994_s1 + $0x48] sm:$0xff] (!%p247_p2)  ;;  %767 = vset.pattern.permute.xlu0 (!%p247_p2), %v812_v13  ;;  %v411_v30 = vshrl.u32 (!%p247_p2), %v410_v29, 7  ;;  %s814_s9 = smov (!%p247_p2), 15   ;;  %s815_s10 = smov (!%p247_p2), 17  }
   0x8   : > { %718 = vmatprep.subr.bf16.mxu0 (!%p247_p2), %v717_v3  ;;  %v308_v14 = vld [vmem:[%s994_s1 + $0x58] sm:$0xff] (!%p247_p2)  ;;  %v723_v15 = vpack.c.bf16 (!%p247_p2), %v303_v11, %v301_v10  ;;  %v305_v17 = vld [vmem:[%s994_s1 + $0x40] sm:$0xff] (!%p247_p2)  ;;  %v307_v18 = vld [vmem:[%s994_s1 + $0x50] sm:$0xff] (!%p247_p2)  ;;  %s816_s11 = smov (!%p247_p2), 127   ;;  %s817_s12 = smov (!%p247_p2), 1   ;;  %vm557_vm9 = vcmask (!%p247_p2), 588800  }
   0x9   : > { %720 = vmatpush1.bf16.msra.mxu0 (!%p247_p2), %v719_v8  ;;  %v725_v16 = vpack.c.bf16 (!%p247_p2), %v308_v14, %v306_v12  ;;  %v390_v19 = vld [vmem:[%s996_s3] sm:$0xff] (!%p247_p2)  ;;  %v310_v20 = vld [vmem:[%s994_s1 + $0x68] sm:$0xff] (!%p247_p2)  ;;  %v312_v21 = vld [vmem:[%s994_s1 + $0x78] sm:$0xff] (!%p247_p2)  ;;  %v727_v23 = vpack.c.bf16 (!%p247_p2), %v307_v18, %v305_v17  ;;  %v452_v31 = vsub.s32 (!%p247_p2), 0, %v411_v30  ;;  %v432_v32 = vsub.s32 (!%p247_p2), 3, %v411_v30  ;;  %s818_s13 = smov (!%p247_p2), 112  }
   0xa   : > { %722 = vmatprep.subr.bf16.mxu0 (!%p247_p2), %v721_v9  ;;  %393 = vperm.xlu0 (!%p247_p2), %767, %v390_v19   ;;  %v398_v22 = vld [vmem:[%s997_s4] sm:$0xff] (!%p247_p2)  ;;  %v729_v24 = vpack.c.bf16 (!%p247_p2), %v312_v21, %v310_v20  ;;  %v311_v26 = vld [vmem:[%s994_s1 + $0x70] sm:$0xff] (!%p247_p2)  ;;  %v412_v33 = vsub.s32 (!%p247_p2), 2, %v411_v30  ;;  %v456_v37 = vsub.s32 (!%p247_p2), 4, %v411_v30  ;;  %v436_v38 = vsub.s32 (!%p247_p2), 7, %v411_v30  ;;  %s819_s14 = smov (!%p247_p2), 113  }
   0xb   : > { %v309_v25 = vld [vmem:[%s994_s1 + $0x60] sm:$0xff] (!%p247_p2)  ;;  %v416_v39 = vsub.s32 (!%p247_p2), 6, %v411_v30  ;;  %v513_v54 = vsub.s32 (!%p247_p2), 1, %v411_v30  ;;  %v517_v55 = vsub.s32 (!%p247_p2), 5, %v411_v30  ;;  %s820_s15 = smov (!%p247_p2), 111   ;;  %v962_v30 = vand.u32 (!%p247_p2), 127, %v410_v29 }
   0xc   : > { %v731_v27 = vpack.c.bf16 (!%p247_p2), %v311_v26, %v309_v25  ;;  %v408_v36 = vld [vmem:[%s999_s6] sm:$0xff] (!%p247_p2) }
   0xd   : > { %s1003_s25 = smov (!%p898_p3, %s701_s25), 1  ;;  %724 = vmatpush1.bf16.msra.mxu0 %v723_v15  ;;  %v453_v44 = vrot.slane %v408_v36, %v452_v31  ;;  %v433_v45 = vrot.slane %v408_v36, %v432_v32  ;;  %v413_v46 = vrot.slane %v408_v36, %v412_v33  ;;  %v457_v48 = vrot.slane %v408_v36, %v456_v37 }
   0xe   : > { %726 = vmatprep.subr.bf16.mxu0 %v725_v16  ;;  %s706_s19 = sshll.u32 %s1003_s25, 3  ;;  %401 = vperm.xlu0 %767, %v398_v22   ;;  %s715_s23 = sshll.u32 %s1003_s25, 4  ;;  %v437_v49 = vrot.slane %v408_v36, %v436_v38  ;;  %v417_v50 = vrot.slane %v408_v36, %v416_v39  ;;  %v514_v5 = vrot.slane %v408_v36, %v513_v54  ;;  %vm485_vm1 = vcmp.lt.s32.totalorder %v962_v30, 16 }
   0xf   : > { %s285_s22 = scalar_lea.vmem %s993_s0, %s706_s19  ;;  %s290_s28 = scalar_lea.vmem %s995_s2, %s715_s23  ;;  %v463_v57 = vrot.slane %v453_v44, %v452_v31  ;;  %v443_v58 = vrot.slane %v433_v45, %v432_v32  ;;  %v423_v59 = vrot.slane %v413_v46, %v412_v33  ;;  %v467_v61 = vrot.slane %v457_v48, %v452_v31 }
  0x10   : > { %v296_v28 = vld [vmem:[%s285_s22] sm:$0xff]  ;;  %v314_v40 = vld [vmem:[%s290_s28 + $0x8] sm:$0xff]  ;;  %v447_v62 = vrot.slane %v437_v49, %v432_v32  ;;  %v427_v63 = vrot.slane %v417_v50, %v412_v33  ;;  %v518_v9 = vrot.slane %v408_v36, %v517_v55  ;;  %v524_v16 = vrot.slane %v514_v5, %v513_v54  ;;  %s295_s20 = scalar_lea.vmem %s1000_s7, %s715_s23 }
  0x11   : > { %728 = vmatpush1.bf16.msra.mxu0 %v727_v23  ;;  %v313_v35 = vld [vmem:[%s290_s28] sm:$0xff]  ;;  %vm476_vm2 = vcmp.lt.s32.totalorder %v962_v30, 17  ;;  %vm494_vm3 = vcmp.lt.s32.totalorder %v962_v30, 15  ;;  %vm501_vm4 = vcmp.lt.s32.totalorder %v962_v30, 1  ;;  %vm508_vm5 = vcmp.lt.s32.totalorder %v962_v30, 127 }
  0x12   : > { %730 = vmatprep.subr.bf16.mxu0 %v729_v24  ;;  %v528_v17 = vrot.slane %v518_v9, %v513_v54  ;;  %vm535_vm6 = vcmp.lt.s32.totalorder %v962_v30, 113  ;;  %vm544_vm7 = vcmp.lt.s32.totalorder %v962_v30, 112  ;;  %vm553_vm8 = vcmp.lt.s32.totalorder %v962_v30, 111 }
  0x15   : > { %732 = vmatpush1.bf16.msra.mxu0 %v731_v27 }
  0x18   : > { %711 = vmatmul.mubr.msk.f32.vlgmr.msra.gmra.mrb[0].mxu0 %vm315_vm0, %v296_v28 }
  0x89   : > { %v394_v34 = vpop.permute.xlu0 %393 }
  0x8d   : > { %v402_v52 = vpop.permute.xlu0 %401 }
  0xeb   : > { %v385_v41 = vpop.f32.mrb[0].mxu0 }
  0xec   : > { %v386_v42 = vadd.f32 %v385_v41, %v313_v35  ;;  %v387_v43 = vpop.f32.mrb[1].mxu0 }
  0xed   : > { %v388_v47 = vadd.f32 %v387_v43, %v314_v40 }
  0xee   : > { %v396_v51 = vmul.f32 %v394_v34, %v386_v42 }
  0xef   : > { %v397_v53 = vmul.f32 %v394_v34, %v388_v47 }
  0xf0   : > { %v404_v56 = vadd.f32 %v402_v52, %v396_v51 }
  0xf1   : > { %v405_v60 = vadd.f32 %v402_v52, %v397_v53 }
  0xf2   : > { %v949_v0 = vmax.f32 %v404_v56, 0.0 }
  0xf3   : > { %v951_v1 = vmax.f32 %v405_v60, 0.0 }
  0xf4   : > { %v479_v2 = vmul.f32 %v463_v57, %v949_v0  ;;  %v448_v3 = vmul.f32 %v443_v58, %v949_v0  ;;  %v428_v4 = vmul.f32 %v423_v59, %v949_v0  ;;  %v538_v20 = vmul.f32 %v524_v16, %v949_v0 }
  0xf5   : > { %v480_v6 = vmul.f32 %v467_v61, %v951_v1  ;;  %v449_v7 = vmul.f32 %v447_v62, %v951_v1  ;;  %v429_v8 = vmul.f32 %v427_v63, %v951_v1  ;;  %v539_v21 = vmul.f32 %v528_v17, %v951_v1 }
  0xf6   : > { %v488_v10 = vmul.f32 %v463_v57, %v448_v3  ;;  %v468_v13 = vmul.f32 %v463_v57, %v428_v4  ;;  %v529_v23 = vmul.f32 %v524_v16, %v428_v4  ;;  %v547_v28 = vmul.f32 %v524_v16, %v448_v3 }
  0xf7   : > { %v768_v11 = vpack.i.bf16 %v480_v6, %v479_v2  ;;  %v489_v12 = vmul.f32 %v467_v61, %v449_v7  ;;  %v469_v14 = vmul.f32 %v467_v61, %v429_v8  ;;  %v788_v19 = vpack.i.bf16 %v449_v7, %v448_v3 }
  0xf8   : > { %v778_v22 = vpack.i.bf16 %v429_v8, %v428_v4  ;;  %v530_v24 = vmul.f32 %v528_v17, %v429_v8  ;;  %v798_v25 = vpack.i.bf16 %v539_v21, %v538_v20  ;;  %v548_v27 = vmul.f32 %v528_v17, %v449_v7 }
  0xf9   : > { %769 = vrot.lane.b32.xlu1 %v768_v11, %s813_s8  ;;  %v783_v15 = vpack.i.bf16 %v489_v12, %v488_v10  ;;  %v773_v18 = vpack.i.bf16 %v469_v14, %v468_v13  ;;  %v556_v13 = vld [vmem:[%s998_s5] sm:$0xff] }
  0xfa   : > { %v793_v26 = vpack.i.bf16 %v530_v24, %v529_v23 }
  0xfb   : > { %784 = vrot.lane.b32.xlu0 %v783_v15, %s814_s9 }
  0xfd   : > { %774 = vrot.lane.b32.xlu1 %v773_v18, %s815_s10 }
  0xff   : > { %789 = vrot.lane.b32.xlu0 %v788_v19, %s816_s11 }
 0x101   : > { %779 = vrot.lane.b32.xlu1 %v778_v22, %s817_s12 }
 0x103   : > { %799 = vrot.lane.b32.xlu0 %v798_v25, %s818_s13 }
 0x105   : > { %794 = vrot.lane.b32.xlu1 %v793_v26, %s819_s14 }
 0x107   : > { %551 = vrot.lane.b32.xlu0 %v548_v27, %s820_s15 }
 0x109   : > { %549 = vrot.lane.b32.xlu1 %v547_v28, %s820_s15 }
 0x16b   : > { %v770_v31 = vpop.permute.xlu1 %769 }
 0x16c   : > { %v772_v32 = vunpack.i.h.bf16 %v770_v31  ;;  %v771_v33 = vunpack.i.l.bf16 %v770_v31 }
 0x16d   : > { %v785_v34 = vpop.permute.xlu0 %784 }
 0x16e   : > { %v787_v38 = vunpack.i.h.bf16 %v785_v34  ;;  %v786_v39 = vunpack.i.l.bf16 %v785_v34  ;;  %v486_v41 = vsel %vm485_vm1, %v771_v33, %v772_v32  ;;  %v487_v42 = vsel %vm485_vm1, %v772_v32, %v771_v33 }
 0x16f   : > { %v775_v35 = vpop.permute.xlu1 %774 }
 0x170   : > { %v777_v36 = vunpack.i.h.bf16 %v775_v35  ;;  %v776_v37 = vunpack.i.l.bf16 %v775_v35  ;;  %v495_v52 = vsel %vm494_vm3, %v786_v39, %v787_v38  ;;  %v496_v54 = vsel %vm494_vm3, %v787_v38, %v786_v39 }
 0x171   : > { %v790_v40 = vpop.permute.xlu0 %789 }
 0x172   : > { %v792_v29 = vunpack.i.h.bf16 %v790_v40  ;;  %v791_v43 = vunpack.i.l.bf16 %v790_v40  ;;  %v477_v44 = vsel %vm476_vm2, %v776_v37, %v777_v36  ;;  %v478_v45 = vsel %vm476_vm2, %v777_v36, %v776_v37 }
 0x173   : > { %v780_v46 = vpop.permute.xlu1 %779  ;;  %v733_v47 = vpack.c.bf16 %v486_v41, %v477_v44  ;;  %v735_v48 = vpack.c.bf16 %v487_v42, %v478_v45 }
 0x174   : > { %v782_v49 = vunpack.i.h.bf16 %v780_v46  ;;  %v781_v50 = vunpack.i.l.bf16 %v780_v46  ;;  %v510_v56 = vsel %vm508_vm5, %v792_v29, %v791_v43  ;;  %v509_v3 = vsel %vm508_vm5, %v791_v43, %v792_v29 }
 0x175   : > { %v800_v51 = vpop.permute.xlu0 %799  ;;  %734 = vmatprep.subr.bf16.mxu1 %v733_v47  ;;  %v741_v2 = vpack.c.bf16 %v510_v56, %v951_v1  ;;  %v743_v5 = vpack.c.bf16 %v509_v3, %v949_v0 }
 0x176   : > { %736 = vmatpush1.bf16.msra.mxu1 %v735_v48  ;;  %v502_v53 = vsel %vm501_vm4, %v781_v50, %v782_v49  ;;  %v503_v55 = vsel %vm501_vm4, %v782_v49, %v781_v50  ;;  %v802_v60 = vunpack.i.h.bf16 %v800_v51  ;;  %v801_v61 = vunpack.i.l.bf16 %v800_v51 }
 0x177   : > { %v795_v57 = vpop.permute.xlu1 %794  ;;  %v737_v58 = vpack.c.bf16 %v502_v53, %v495_v52  ;;  %v739_v59 = vpack.c.bf16 %v503_v55, %v496_v54 }
 0x178   : > { %v797_v62 = vunpack.i.h.bf16 %v795_v57  ;;  %v796_v63 = vunpack.i.l.bf16 %v795_v57  ;;  %v546_v6 = vsel %vm544_vm7, %v802_v60, %v801_v61  ;;  %v545_v10 = vsel %vm544_vm7, %v801_v61, %v802_v60 }
 0x179   : > { %738 = vmatprep.subr.bf16.mxu1 %v737_v58  ;;  %v552_v11 = vpop.permute.xlu0 %551 }
 0x17a   : > { %740 = vmatpush1.bf16.msra.mxu1 %v739_v59  ;;  %v537_v4 = vsel %vm535_vm6, %v797_v62, %v796_v63  ;;  %v536_v8 = vsel %vm535_vm6, %v796_v63, %v797_v62 }
 0x17b   : > { %742 = vmatprep.subr.bf16.mxu1 %v741_v2  ;;  %v745_v7 = vpack.c.bf16 %v546_v6, %v537_v4  ;;  %v550_v9 = vpop.permute.xlu1 %549  ;;  %v747_v1 = vpack.c.bf16 %v545_v10, %v536_v8 }
 0x17c   : > { %v555_v12 = vsel %vm553_vm8, %v552_v11, %v550_v9  ;;  %v554_v0 = vsel %vm553_vm8, %v550_v9, %v552_v11 }
 0x17e   : > { %744 = vmatpush1.bf16.msra.mxu1 %v743_v5 }
 0x17f   : > { %746 = vmatprep.subr.bf16.mxu1 %v745_v7 }
 0x182   : > { %748 = vmatpush1.bf16.msra.mxu1 %v747_v1 }
 0x183   : > { %577 = vmatprep.subr.mxu1 %v555_v12 }
 0x186   : > { %578 = vmatpush1.msra.mxu1 %v554_v0 }
 0x187   : > { %712 = vmatmul.mubr.msk.f32.vlgmr.msra.gmra.mrb[0].mxu1 %vm557_vm9, %v556_v13 }
 0x25a   : > { %v627_v14 = vpop.f32.mrb[0].mxu1 }
 0x25b   : > { %632 = vst [vmem:[%s295_s20] sm:$0xff] %v627_v14  ;;  %v629_v15 = vpop.f32.mrb[1].mxu1 }
 0x25c   : > { %633 = vst [vmem:[%s295_s20 + $0x8] sm:$0xff] %v629_v15 }
 0x25d PF: > { %s17_s24 = sadd.s32 1, %s809_s24  }
 0x25e   : > { %p14_p4 = scmp.ge.s32.totalorder %s17_s24, 4  }
 0x260   :  { %16 = sbr.rel (!%p14_p4) target bundleno = 1 (0x1), region = 81 }

// kernel: dappm_forward.8
= control target key start
LH: loop header
LB: loop body
LE: loop exit
PB: predicated region body
PF: predicated region fallthrough
CT: control target
= control target key end

     0   :  { %s837_s24 = smov 0   ;;  %s923_s0 = inlined_call_operand.vmem [shape: f32[2,8,16], index: 0, kind: input, shape index: {}]   ;;  %s924_s1 = inlined_call_operand.vmem [shape: f32[16,256], index: 1, kind: input, shape index: {}]   ;;  %s925_s2 = inlined_call_operand.vmem [shape: f32[2,8,256], index: 2, kind: input, shape index: {}]   ;;  %s926_s3 = inlined_call_operand.vmem [shape: f32[8,1], index: 3, kind: input, shape index: {}]   ;;  %s927_s4 = inlined_call_operand.vmem [shape: f32[8,1], index: 4, kind: input, shape index: {}]   ;;  %s928_s5 = inlined_call_operand.vmem [shape: f32[8,72], index: 5, kind: input, shape index: {}]   ;;  %s929_s6 = inlined_call_operand.vmem [shape: f32[4,256], index: 6, kind: input, shape index: {}]   ;;  %s930_s7 = inlined_call_operand.vmem [shape: f32[2,8,256], index: 7, kind: output, shape index: {}]  }
   0x1 LB: > { %s689_s25 = sadd.s32 4294967295, %s785_s24   ;;  %p693_p0 = scmp.ge.s32.totalorder %s785_s24, 1  ;;  %s785_s24 = sphi %s837_s24, %s17_s24  }
   0x2   : > { %p246_p1 = scmp.lt.s32.totalorder %s785_s24, 3 }
   0x4   : > { %p247_p2 = pnand %p693_p0, %p246_p1 }
   0x5   : > { %v298_v0 = vld [vmem:[%s924_s1 + $0x8] sm:$0xff] (!%p247_p2)  ;;  %v300_v1 = vld [vmem:[%s924_s1 + $0x18] sm:$0xff] (!%p247_p2)  ;;  %v297_v2 = vld [vmem:[%s924_s1] sm:$0xff] (!%p247_p2)  ;;  %p282_p3 = scmp.lt.s32.totalorder (!%p247_p2), %s689_s25, 1  ;;  %v787_v5 = vmov (!%p247_p2), 0.0   ;;  %v788_v8 = vmov (!%p247_p2), 0   ;;  %v398_v11 = vlaneseq (!%p247_p2) }
   0x6   : > { %250 = sbr.rel (%p247_p2) target bundleno = 598 (0x256), region = 48  ;;  %v705_v3 = vpack.c.bf16 (!%p247_p2), %v300_v1, %v298_v0  ;;  %v299_v4 = vld [vmem:[%s924_s1 + $0x10] sm:$0xff] (!%p247_p2)  ;;  %371 = vmatprep.mubr.f32.mxu0 (!%p247_p2), %v787_v5  ;;  %v378_v6 = vld [vmem:[%s926_s3] sm:$0xff] (!%p247_p2)  ;;  %613 = vmatprep.mubr.f32.mxu1 (!%p247_p2), %v787_v5  ;;  %vm303_vm0 = vcmask (!%p247_p2), 130048   ;;  %s789_s27 = smov (!%p247_p2), 16   ;;  %vm545_vm9 = vcmask (!%p247_p2), 588800  }
   0x7   : > { %v707_v7 = vpack.c.bf16 (!%p247_p2), %v299_v4, %v297_v2  ;;  %743 = vset.pattern.permute.xlu0 (!%p247_p2), %v788_v8  ;;  %v386_v9 = vld [vmem:[%s927_s4] sm:$0xff] (!%p247_p2)  ;;  %v399_v12 = vshrl.u32 (!%p247_p2), %v398_v11, 7  ;;  %s790_s28 = smov (!%p247_p2), 15   ;;  %s791_s29 = smov (!%p247_p2), 17  }
   0x8   : > { %706 = vmatprep.subr.bf16.mxu0 (!%p247_p2), %v705_v3  ;;  %381 = vperm.xlu0 (!%p247_p2), %743, %v378_v6   ;;  %v396_v18 = vld [vmem:[%s929_s6] sm:$0xff] (!%p247_p2)  ;;  %s792_s30 = smov (!%p247_p2), 127   ;;  %s793_s8 = smov (!%p247_p2), 1  }
   0x9   : > { %708 = vmatpush1.bf16.msra.mxu0 (!%p247_p2), %v707_v7  ;;  %v440_v13 = vsub.s32 (!%p247_p2), 0, %v399_v12  ;;  %v420_v14 = vsub.s32 (!%p247_p2), 3, %v399_v12  ;;  %v400_v15 = vsub.s32 (!%p247_p2), 2, %v399_v12  ;;  %v444_v19 = vsub.s32 (!%p247_p2), 4, %v399_v12  ;;  %s794_s9 = smov (!%p247_p2), 112   ;;  %s795_s10 = smov (!%p247_p2), 113  }
   0xa   : > { %v424_v20 = vsub.s32 (!%p247_p2), 7, %v399_v12  ;;  %v404_v21 = vsub.s32 (!%p247_p2), 6, %v399_v12  ;;  %v501_v36 = vsub.s32 (!%p247_p2), 1, %v399_v12  ;;  %v505_v37 = vsub.s32 (!%p247_p2), 5, %v399_v12  ;;  %s796_s11 = smov (!%p247_p2), 111  }
   0xb   : > { %v441_v26 = vrot.slane (!%p247_p2), %v396_v18, %v440_v13  ;;  %v421_v27 = vrot.slane (!%p247_p2), %v396_v18, %v420_v14  ;;  %v401_v28 = vrot.slane (!%p247_p2), %v396_v18, %v400_v15  ;;  %v445_v30 = vrot.slane (!%p247_p2), %v396_v18, %v444_v19 }
   0xc   : > { %389 = vperm.xlu0 (!%p247_p2), %743, %v386_v9   ;;  %v425_v31 = vrot.slane (!%p247_p2), %v396_v18, %v424_v20  ;;  %v405_v32 = vrot.slane (!%p247_p2), %v396_v18, %v404_v21  ;;  %v502_v51 = vrot.slane (!%p247_p2), %v396_v18, %v501_v36  ;;  %v506_v55 = vrot.slane (!%p247_p2), %v396_v18, %v505_v37 }
   0xd   : > { %s932_s25 = smov (!%p282_p3, %s689_s25), 1  ;;  %v451_v39 = vrot.slane %v441_v26, %v440_v13  ;;  %v431_v40 = vrot.slane %v421_v27, %v420_v14  ;;  %v411_v41 = vrot.slane %v401_v28, %v400_v15  ;;  %v455_v43 = vrot.slane %v445_v30, %v440_v13 }
   0xe   : > { %s694_s13 = sshll.u32 %s932_s25, 3  ;;  %s703_s19 = sshll.u32 %s932_s25, 4  ;;  %v435_v44 = vrot.slane %v425_v31, %v420_v14  ;;  %v415_v45 = vrot.slane %v405_v32, %v400_v15  ;;  %v512_v62 = vrot.slane %v502_v51, %v501_v36  ;;  %v516_v63 = vrot.slane %v506_v55, %v501_v36 }
   0xf   : > { %s285_s18 = scalar_lea.vmem %s923_s0, %s694_s13  ;;  %s290_s22 = scalar_lea.vmem %s925_s2, %s703_s19  ;;  %v892_v12 = vand.u32 127, %v398_v11 }
  0x10   : > { %v296_v10 = vld [vmem:[%s285_s18] sm:$0xff]  ;;  %v302_v22 = vld [vmem:[%s290_s22 + $0x8] sm:$0xff]  ;;  %s295_s16 = scalar_lea.vmem %s930_s7, %s703_s19 }
  0x11   : > { %699 = vmatmul.mubr.msk.f32.vlgmr.msra.gmra.mrb[0].mxu0 %vm303_vm0, %v296_v10  ;;  %v301_v17 = vld [vmem:[%s290_s22] sm:$0xff]  ;;  %vm473_vm1 = vcmp.lt.s32.totalorder %v892_v12, 16  ;;  %vm464_vm2 = vcmp.lt.s32.totalorder %v892_v12, 17  ;;  %vm482_vm3 = vcmp.lt.s32.totalorder %v892_v12, 15  ;;  %vm489_vm4 = vcmp.lt.s32.totalorder %v892_v12, 1 }
  0x12   : > { %vm496_vm5 = vcmp.lt.s32.totalorder %v892_v12, 127  ;;  %vm523_vm6 = vcmp.lt.s32.totalorder %v892_v12, 113  ;;  %vm532_vm7 = vcmp.lt.s32.totalorder %v892_v12, 112  ;;  %vm541_vm8 = vcmp.lt.s32.totalorder %v892_v12, 111 }
  0x87   : > { %v382_v16 = vpop.permute.xlu0 %381 }
  0x8b   : > { %v390_v34 = vpop.permute.xlu0 %389 }
  0xe4   : > { %v373_v23 = vpop.f32.mrb[0].mxu0 }
  0xe5   : > { %v374_v24 = vadd.f32 %v373_v23, %v301_v17  ;;  %v375_v25 = vpop.f32.mrb[1].mxu0 }
  0xe6   : > { %v376_v29 = vadd.f32 %v375_v25, %v302_v22 }
  0xe7   : > { %v384_v33 = vmul.f32 %v382_v16, %v374_v24 }
  0xe8   : > { %v385_v35 = vmul.f32 %v382_v16, %v376_v29 }
  0xe9   : > { %v392_v38 = vadd.f32 %v390_v34, %v384_v33 }
  0xea   : > { %v393_v42 = vadd.f32 %v390_v34, %v385_v35 }
  0xeb   : > { %v879_v46 = vmax.f32 %v392_v38, 0.0 }
  0xec   : > { %v881_v47 = vmax.f32 %v393_v42, 0.0 }
  0xed   : > { %v467_v48 = vmul.f32 %v451_v39, %v879_v46  ;;  %v436_v49 = vmul.f32 %v431_v40, %v879_v46  ;;  %v416_v50 = vmul.f32 %v411_v41, %v879_v46  ;;  %v526_v2 = vmul.f32 %v512_v62, %v879_v46 }
  0xee   : > { %v468_v52 = vmul.f32 %v455_v43, %v881_v47  ;;  %v437_v53 = vmul.f32 %v435_v44, %v881_v47  ;;  %v417_v54 = vmul.f32 %v415_v45, %v881_v47  ;;  %v527_v3 = vmul.f32 %v516_v63, %v881_v47 }
  0xef   : > { %v476_v56 = vmul.f32 %v451_v39, %v436_v49  ;;  %v456_v59 = vmul.f32 %v451_v39, %v416_v50  ;;  %v517_v5 = vmul.f32 %v512_v62, %v416_v50  ;;  %v535_v10 = vmul.f32 %v512_v62, %v436_v49 }
  0xf0   : > { %v744_v57 = vpack.i.bf16 %v468_v52, %v467_v48  ;;  %v477_v58 = vmul.f32 %v455_v43, %v437_v53  ;;  %v457_v60 = vmul.f32 %v455_v43, %v417_v54  ;;  %v764_v1 = vpack.i.bf16 %v437_v53, %v436_v49 }
  0xf1   : > { %v754_v4 = vpack.i.bf16 %v417_v54, %v416_v50  ;;  %v518_v6 = vmul.f32 %v516_v63, %v417_v54  ;;  %v774_v7 = vpack.i.bf16 %v527_v3, %v526_v2  ;;  %v536_v9 = vmul.f32 %v516_v63, %v437_v53 }
  0xf2   : > { %745 = vrot.lane.b32.xlu1 %v744_v57, %s789_s27  ;;  %v759_v61 = vpack.i.bf16 %v477_v58, %v476_v56  ;;  %v749_v0 = vpack.i.bf16 %v457_v60, %v456_v59  ;;  %v544_v59 = vld [vmem:[%s928_s5] sm:$0xff] }
  0xf3   : > { %v769_v8 = vpack.i.bf16 %v518_v6, %v517_v5 }
  0xf4   : > { %760 = vrot.lane.b32.xlu0 %v759_v61, %s790_s28 }
  0xf6   : > { %750 = vrot.lane.b32.xlu1 %v749_v0, %s791_s29 }
  0xf8   : > { %765 = vrot.lane.b32.xlu0 %v764_v1, %s792_s30 }
  0xfa   : > { %755 = vrot.lane.b32.xlu1 %v754_v4, %s793_s8 }
  0xfc   : > { %775 = vrot.lane.b32.xlu0 %v774_v7, %s794_s9 }
  0xfe   : > { %770 = vrot.lane.b32.xlu1 %v769_v8, %s795_s10 }
 0x100   : > { %539 = vrot.lane.b32.xlu0 %v536_v9, %s796_s11 }
 0x102   : > { %537 = vrot.lane.b32.xlu1 %v535_v10, %s796_s11 }
 0x164   : > { %v746_v13 = vpop.permute.xlu1 %745 }
 0x165   : > { %v748_v14 = vunpack.i.h.bf16 %v746_v13  ;;  %v747_v15 = vunpack.i.l.bf16 %v746_v13 }
 0x166   : > { %v761_v16 = vpop.permute.xlu0 %760 }
 0x167   : > { %v763_v20 = vunpack.i.h.bf16 %v761_v16  ;;  %v762_v21 = vunpack.i.l.bf16 %v761_v16  ;;  %v474_v23 = vsel %vm473_vm1, %v747_v15, %v748_v14  ;;  %v475_v24 = vsel %vm473_vm1, %v748_v14, %v747_v15 }
 0x168   : > { %v751_v17 = vpop.permute.xlu1 %750 }
 0x169   : > { %v753_v18 = vunpack.i.h.bf16 %v751_v17  ;;  %v752_v19 = vunpack.i.l.bf16 %v751_v17  ;;  %v483_v34 = vsel %vm482_vm3, %v762_v21, %v763_v20  ;;  %v484_v36 = vsel %vm482_vm3, %v763_v20, %v762_v21 }
 0x16a   : > { %v766_v22 = vpop.permute.xlu0 %765 }
 0x16b   : > { %v768_v11 = vunpack.i.h.bf16 %v766_v22  ;;  %v767_v25 = vunpack.i.l.bf16 %v766_v22  ;;  %v465_v26 = vsel %vm464_vm2, %v752_v19, %v753_v18  ;;  %v466_v27 = vsel %vm464_vm2, %v753_v18, %v752_v19 }
 0x16c   : > { %v756_v28 = vpop.permute.xlu1 %755  ;;  %v709_v29 = vpack.c.bf16 %v474_v23, %v465_v26  ;;  %v711_v30 = vpack.c.bf16 %v475_v24, %v466_v27 }
 0x16d   : > { %v758_v31 = vunpack.i.h.bf16 %v756_v28  ;;  %v757_v32 = vunpack.i.l.bf16 %v756_v28  ;;  %v498_v38 = vsel %vm496_vm5, %v768_v11, %v767_v25  ;;  %v497_v49 = vsel %vm496_vm5, %v767_v25, %v768_v11 }
 0x16e   : > { %v776_v33 = vpop.permute.xlu0 %775  ;;  %710 = vmatprep.subr.bf16.mxu1 %v709_v29  ;;  %v717_v48 = vpack.c.bf16 %v498_v38, %v881_v47  ;;  %v719_v51 = vpack.c.bf16 %v497_v49, %v879_v46 }
 0x16f   : > { %712 = vmatpush1.bf16.msra.mxu1 %v711_v30  ;;  %v490_v35 = vsel %vm489_vm4, %v757_v32, %v758_v31  ;;  %v491_v37 = vsel %vm489_vm4, %v758_v31, %v757_v32  ;;  %v778_v42 = vunpack.i.h.bf16 %v776_v33  ;;  %v777_v43 = vunpack.i.l.bf16 %v776_v33 }
 0x170   : > { %v771_v39 = vpop.permute.xlu1 %770  ;;  %v713_v40 = vpack.c.bf16 %v490_v35, %v483_v34  ;;  %v715_v41 = vpack.c.bf16 %v491_v37, %v484_v36 }
 0x171   : > { %v773_v44 = vunpack.i.h.bf16 %v771_v39  ;;  %v772_v45 = vunpack.i.l.bf16 %v771_v39  ;;  %v534_v52 = vsel %vm532_vm7, %v778_v42, %v777_v43  ;;  %v533_v56 = vsel %vm532_vm7, %v777_v43, %v778_v42 }
 0x172   : > { %714 = vmatprep.subr.bf16.mxu1 %v713_v40  ;;  %v540_v57 = vpop.permute.xlu0 %539 }
 0x173   : > { %716 = vmatpush1.bf16.msra.mxu1 %v715_v41  ;;  %v525_v50 = vsel %vm523_vm6, %v773_v44, %v772_v45  ;;  %v524_v54 = vsel %vm523_vm6, %v772_v45, %v773_v44 }
 0x174   : > { %718 = vmatprep.subr.bf16.mxu1 %v717_v48  ;;  %v721_v53 = vpack.c.bf16 %v534_v52, %v525_v50  ;;  %v538_v55 = vpop.permute.xlu1 %537  ;;  %v723_v47 = vpack.c.bf16 %v533_v56, %v524_v54 }
 0x175   : > { %v543_v58 = vsel %vm541_vm8, %v540_v57, %v538_v55  ;;  %v542_v46 = vsel %vm541_vm8, %v538_v55, %v540_v57 }
 0x177   : > { %720 = vmatpush1.bf16.msra.mxu1 %v719_v51 }
 0x178   : > { %722 = vmatprep.subr.bf16.mxu1 %v721_v53 }
 0x17b   : > { %724 = vmatpush1.bf16.msra.mxu1 %v723_v47 }
 0x17c   : > { %565 = vmatprep.subr.mxu1 %v543_v58 }
 0x17f   : > { %566 = vmatpush1.msra.mxu1 %v542_v46 }
 0x180   : > { %700 = vmatmul.mubr.msk.f32.vlgmr.msra.gmra.mrb[0].mxu1 %vm545_vm9, %v544_v59 }
 0x253   : > { %v615_v60 = vpop.f32.mrb[0].mxu1 }
 0x254   : > { %620 = vst [vmem:[%s295_s16] sm:$0xff] %v615_v60  ;;  %v617_v61 = vpop.f32.mrb[1].mxu1 }
 0x255   : > { %621 = vst [vmem:[%s295_s16 + $0x8] sm:$0xff] %v617_v61 }
 0x256 PF: > { %s17_s24 = sadd.s32 1, %s785_s24  }
 0x257   : > { %p14_p4 = scmp.ge.s32.totalorder %s17_s24, 4  }
 0x259   :  { %16 = sbr.rel (!%p14_p4) target bundleno = 1 (0x1), region = 81 }

// kernel: dappm_forward.9
= control target key start
LH: loop header
LB: loop body
LE: loop exit
PB: predicated region body
PF: predicated region fallthrough
CT: control target
= control target key end

     0   :  { %s831_s24 = smov 0   ;;  %s911_s0 = inlined_call_operand.vmem [shape: f32[2,8,8], index: 0, kind: input, shape index: {}]   ;;  %s912_s1 = inlined_call_operand.vmem [shape: f32[8,256], index: 1, kind: input, shape index: {}]   ;;  %s913_s2 = inlined_call_operand.vmem [shape: f32[2,8,256], index: 2, kind: input, shape index: {}]   ;;  %s914_s3 = inlined_call_operand.vmem [shape: f32[8,1], index: 3, kind: input, shape index: {}]   ;;  %s915_s4 = inlined_call_operand.vmem [shape: f32[8,1], index: 4, kind: input, shape index: {}]   ;;  %s916_s5 = inlined_call_operand.vmem [shape: f32[8,72], index: 5, kind: input, shape index: {}]   ;;  %s917_s6 = inlined_call_operand.vmem [shape: f32[4,256], index: 6, kind: input, shape index: {}]   ;;  %s918_s7 = inlined_call_operand.vmem [shape: f32[2,8,256], index: 7, kind: output, shape index: {}]  }
   0x1 LB: > { %s687_s25 = sadd.s32 4294967295, %s779_s24   ;;  %p691_p0 = scmp.ge.s32.totalorder %s779_s24, 1  ;;  %s779_s24 = sphi %s831_s24, %s17_s24  }
   0x2   : > { %p246_p1 = scmp.lt.s32.totalorder %s779_s24, 3 }
   0x4   : > { %p247_p2 = pnand %p691_p0, %p246_p1 }
   0x5   : > { %v298_v0 = vld [vmem:[%s912_s1 + $0x8] sm:$0xff] (!%p247_p2)  ;;  %v297_v1 = vld [vmem:[%s912_s1] sm:$0xff] (!%p247_p2)  ;;  %p282_p3 = scmp.lt.s32.totalorder (!%p247_p2), %s687_s25, 1  ;;  %v781_v2 = vmov (!%p247_p2), 0.0   ;;  %v782_v4 = vmov (!%p247_p2), 0   ;;  %vm301_vm0 = vcmask (!%p247_p2), 64512   ;;  %v396_v7 = vlaneseq (!%p247_p2) }
   0x6   : > { %250 = sbr.rel (%p247_p2) target bundleno = 598 (0x256), region = 48  ;;  %305 = vmatprep.subr.mxu0 (!%p247_p2), %v298_v0  ;;  %369 = vmatprep.mubr.f32.mxu0 (!%p247_p2), %v781_v2  ;;  %v376_v3 = vld [vmem:[%s914_s3] sm:$0xff] (!%p247_p2)  ;;  %s783_s21 = smov (!%p247_p2), 16   ;;  %vm543_vm9 = vcmask (!%p247_p2), 588800  }
   0x7   : > { %306 = vmatpush1.msra.mxu0 (!%p247_p2), %v297_v1  ;;  %737 = vset.pattern.permute.xlu0 (!%p247_p2), %v782_v4  ;;  %v384_v5 = vld [vmem:[%s915_s4] sm:$0xff] (!%p247_p2)  ;;  %v397_v8 = vshrl.u32 (!%p247_p2), %v396_v7, 7  ;;  %s784_s22 = smov (!%p247_p2), 15   ;;  %s785_s23 = smov (!%p247_p2), 17  }
   0x8   : > { %379 = vperm.xlu0 (!%p247_p2), %737, %v376_v3   ;;  %611 = vmatprep.mubr.f32.mxu1 (!%p247_p2), %v781_v2  ;;  %v394_v14 = vld [vmem:[%s917_s6] sm:$0xff] (!%p247_p2)  ;;  %s786_s26 = smov (!%p247_p2), 127   ;;  %s787_s27 = smov (!%p247_p2), 1  }
   0x9   : > { %v438_v9 = vsub.s32 (!%p247_p2), 0, %v397_v8  ;;  %v418_v10 = vsub.s32 (!%p247_p2), 3, %v397_v8  ;;  %v398_v11 = vsub.s32 (!%p247_p2), 2, %v397_v8  ;;  %v442_v15 = vsub.s32 (!%p247_p2), 4, %v397_v8  ;;  %s788_s28 = smov (!%p247_p2), 112   ;;  %s789_s29 = smov (!%p247_p2), 113  }
   0xa   : > { %v422_v16 = vsub.s32 (!%p247_p2), 7, %v397_v8  ;;  %v402_v17 = vsub.s32 (!%p247_p2), 6, %v397_v8  ;;  %v499_v32 = vsub.s32 (!%p247_p2), 1, %v397_v8  ;;  %v503_v33 = vsub.s32 (!%p247_p2), 5, %v397_v8  ;;  %s790_s30 = smov (!%p247_p2), 111  }
   0xb   : > { %v439_v22 = vrot.slane (!%p247_p2), %v394_v14, %v438_v9  ;;  %v419_v23 = vrot.slane (!%p247_p2), %v394_v14, %v418_v10  ;;  %v399_v24 = vrot.slane (!%p247_p2), %v394_v14, %v398_v11  ;;  %v443_v26 = vrot.slane (!%p247_p2), %v394_v14, %v442_v15 }
   0xc   : > { %387 = vperm.xlu0 (!%p247_p2), %737, %v384_v5   ;;  %v423_v27 = vrot.slane (!%p247_p2), %v394_v14, %v422_v16  ;;  %v403_v28 = vrot.slane (!%p247_p2), %v394_v14, %v402_v17  ;;  %v500_v47 = vrot.slane (!%p247_p2), %v394_v14, %v499_v32  ;;  %v504_v51 = vrot.slane (!%p247_p2), %v394_v14, %v503_v33 }
   0xd   : > { %s920_s25 = smov (!%p282_p3, %s687_s25), 1  ;;  %v449_v35 = vrot.slane %v439_v22, %v438_v9  ;;  %v429_v36 = vrot.slane %v419_v23, %v418_v10  ;;  %v409_v37 = vrot.slane %v399_v24, %v398_v11  ;;  %v453_v39 = vrot.slane %v443_v26, %v438_v9 }
   0xe   : > { %s692_s9 = sshll.u32 %s920_s25, 3  ;;  %s701_s15 = sshll.u32 %s920_s25, 4  ;;  %v433_v40 = vrot.slane %v423_v27, %v418_v10  ;;  %v413_v41 = vrot.slane %v403_v28, %v398_v11  ;;  %v510_v58 = vrot.slane %v500_v47, %v499_v32  ;;  %v514_v59 = vrot.slane %v504_v51, %v499_v32 }
   0xf   : > { %s285_s14 = scalar_lea.vmem %s911_s0, %s692_s9  ;;  %s290_s18 = scalar_lea.vmem %s913_s2, %s701_s15  ;;  %v880_v8 = vand.u32 127, %v396_v7 }
  0x10   : > { %v296_v6 = vld [vmem:[%s285_s14] sm:$0xff]  ;;  %v300_v18 = vld [vmem:[%s290_s18 + $0x8] sm:$0xff]  ;;  %s295_s12 = scalar_lea.vmem %s918_s7, %s701_s15 }
  0x11   : > { %697 = vmatmul.mubr.msk.f32.vlgmr.msra.gmra.mrb[0].mxu0 %vm301_vm0, %v296_v6  ;;  %v299_v13 = vld [vmem:[%s290_s18] sm:$0xff]  ;;  %vm471_vm1 = vcmp.lt.s32.totalorder %v880_v8, 16  ;;  %vm462_vm2 = vcmp.lt.s32.totalorder %v880_v8, 17  ;;  %vm480_vm3 = vcmp.lt.s32.totalorder %v880_v8, 15  ;;  %vm487_vm4 = vcmp.lt.s32.totalorder %v880_v8, 1 }
  0x12   : > { %vm494_vm5 = vcmp.lt.s32.totalorder %v880_v8, 127  ;;  %vm521_vm6 = vcmp.lt.s32.totalorder %v880_v8, 113  ;;  %vm530_vm7 = vcmp.lt.s32.totalorder %v880_v8, 112  ;;  %vm539_vm8 = vcmp.lt.s32.totalorder %v880_v8, 111 }
  0x87   : > { %v380_v12 = vpop.permute.xlu0 %379 }
  0x8b   : > { %v388_v30 = vpop.permute.xlu0 %387 }
  0xe4   : > { %v371_v19 = vpop.f32.mrb[0].mxu0 }
  0xe5   : > { %v372_v20 = vadd.f32 %v371_v19, %v299_v13  ;;  %v373_v21 = vpop.f32.mrb[1].mxu0 }
  0xe6   : > { %v374_v25 = vadd.f32 %v373_v21, %v300_v18 }
  0xe7   : > { %v382_v29 = vmul.f32 %v380_v12, %v372_v20 }
  0xe8   : > { %v383_v31 = vmul.f32 %v380_v12, %v374_v25 }
  0xe9   : > { %v390_v34 = vadd.f32 %v388_v30, %v382_v29 }
  0xea   : > { %v391_v38 = vadd.f32 %v388_v30, %v383_v31 }
  0xeb   : > { %v867_v42 = vmax.f32 %v390_v34, 0.0 }
  0xec   : > { %v869_v43 = vmax.f32 %v391_v38, 0.0 }
  0xed   : > { %v465_v44 = vmul.f32 %v449_v35, %v867_v42  ;;  %v434_v45 = vmul.f32 %v429_v36, %v867_v42  ;;  %v414_v46 = vmul.f32 %v409_v37, %v867_v42  ;;  %v524_v62 = vmul.f32 %v510_v58, %v867_v42 }
  0xee   : > { %v466_v48 = vmul.f32 %v453_v39, %v869_v43  ;;  %v435_v49 = vmul.f32 %v433_v40, %v869_v43  ;;  %v415_v50 = vmul.f32 %v413_v41, %v869_v43  ;;  %v525_v63 = vmul.f32 %v514_v59, %v869_v43 }
  0xef   : > { %v474_v52 = vmul.f32 %v449_v35, %v434_v45  ;;  %v454_v55 = vmul.f32 %v449_v35, %v414_v46  ;;  %v515_v1 = vmul.f32 %v510_v58, %v414_v46  ;;  %v533_v6 = vmul.f32 %v510_v58, %v434_v45 }
  0xf0   : > { %v738_v53 = vpack.i.bf16 %v466_v48, %v465_v44  ;;  %v475_v54 = vmul.f32 %v453_v39, %v435_v49  ;;  %v455_v56 = vmul.f32 %v453_v39, %v415_v50  ;;  %v758_v61 = vpack.i.bf16 %v435_v49, %v434_v45 }
  0xf1   : > { %v748_v0 = vpack.i.bf16 %v415_v50, %v414_v46  ;;  %v516_v2 = vmul.f32 %v514_v59, %v415_v50  ;;  %v768_v3 = vpack.i.bf16 %v525_v63, %v524_v62  ;;  %v534_v5 = vmul.f32 %v514_v59, %v435_v49 }
  0xf2   : > { %739 = vrot.lane.b32.xlu1 %v738_v53, %s783_s21  ;;  %v753_v57 = vpack.i.bf16 %v475_v54, %v474_v52  ;;  %v743_v60 = vpack.i.bf16 %v455_v56, %v454_v55  ;;  %v542_v55 = vld [vmem:[%s916_s5] sm:$0xff] }
  0xf3   : > { %v763_v4 = vpack.i.bf16 %v516_v2, %v515_v1 }
  0xf4   : > { %754 = vrot.lane.b32.xlu0 %v753_v57, %s784_s22 }
  0xf6   : > { %744 = vrot.lane.b32.xlu1 %v743_v60, %s785_s23 }
  0xf8   : > { %759 = vrot.lane.b32.xlu0 %v758_v61, %s786_s26 }
  0xfa   : > { %749 = vrot.lane.b32.xlu1 %v748_v0, %s787_s27 }
  0xfc   : > { %769 = vrot.lane.b32.xlu0 %v768_v3, %s788_s28 }
  0xfe   : > { %764 = vrot.lane.b32.xlu1 %v763_v4, %s789_s29 }
 0x100   : > { %537 = vrot.lane.b32.xlu0 %v534_v5, %s790_s30 }
 0x102   : > { %535 = vrot.lane.b32.xlu1 %v533_v6, %s790_s30 }
 0x164   : > { %v740_v9 = vpop.permute.xlu1 %739 }
 0x165   : > { %v742_v10 = vunpack.i.h.bf16 %v740_v9  ;;  %v741_v11 = vunpack.i.l.bf16 %v740_v9 }
 0x166   : > { %v755_v12 = vpop.permute.xlu0 %754 }
 0x167   : > { %v757_v16 = vunpack.i.h.bf16 %v755_v12  ;;  %v756_v17 = vunpack.i.l.bf16 %v755_v12  ;;  %v472_v19 = vsel %vm471_vm1, %v741_v11, %v742_v10  ;;  %v473_v20 = vsel %vm471_vm1, %v742_v10, %v741_v11 }
 0x168   : > { %v745_v13 = vpop.permute.xlu1 %744 }
 0x169   : > { %v747_v14 = vunpack.i.h.bf16 %v745_v13  ;;  %v746_v15 = vunpack.i.l.bf16 %v745_v13  ;;  %v481_v30 = vsel %vm480_vm3, %v756_v17, %v757_v16  ;;  %v482_v32 = vsel %vm480_vm3, %v757_v16, %v756_v17 }
 0x16a   : > { %v760_v18 = vpop.permute.xlu0 %759 }
 0x16b   : > { %v762_v7 = vunpack.i.h.bf16 %v760_v18  ;;  %v761_v21 = vunpack.i.l.bf16 %v760_v18  ;;  %v463_v22 = vsel %vm462_vm2, %v746_v15, %v747_v14  ;;  %v464_v23 = vsel %vm462_vm2, %v747_v14, %v746_v15 }
 0x16c   : > { %v750_v24 = vpop.permute.xlu1 %749  ;;  %v703_v25 = vpack.c.bf16 %v472_v19, %v463_v22  ;;  %v705_v26 = vpack.c.bf16 %v473_v20, %v464_v23 }
 0x16d   : > { %v752_v27 = vunpack.i.h.bf16 %v750_v24  ;;  %v751_v28 = vunpack.i.l.bf16 %v750_v24  ;;  %v496_v34 = vsel %vm494_vm5, %v762_v7, %v761_v21  ;;  %v495_v45 = vsel %vm494_vm5, %v761_v21, %v762_v7 }
 0x16e   : > { %v770_v29 = vpop.permute.xlu0 %769  ;;  %704 = vmatprep.subr.bf16.mxu1 %v703_v25  ;;  %v711_v44 = vpack.c.bf16 %v496_v34, %v869_v43  ;;  %v713_v47 = vpack.c.bf16 %v495_v45, %v867_v42 }
 0x16f   : > { %706 = vmatpush1.bf16.msra.mxu1 %v705_v26  ;;  %v488_v31 = vsel %vm487_vm4, %v751_v28, %v752_v27  ;;  %v489_v33 = vsel %vm487_vm4, %v752_v27, %v751_v28  ;;  %v772_v38 = vunpack.i.h.bf16 %v770_v29  ;;  %v771_v39 = vunpack.i.l.bf16 %v770_v29 }
 0x170   : > { %v765_v35 = vpop.permute.xlu1 %764  ;;  %v707_v36 = vpack.c.bf16 %v488_v31, %v481_v30  ;;  %v709_v37 = vpack.c.bf16 %v489_v33, %v482_v32 }
 0x171   : > { %v767_v40 = vunpack.i.h.bf16 %v765_v35  ;;  %v766_v41 = vunpack.i.l.bf16 %v765_v35  ;;  %v532_v48 = vsel %vm530_vm7, %v772_v38, %v771_v39  ;;  %v531_v52 = vsel %vm530_vm7, %v771_v39, %v772_v38 }
 0x172   : > { %708 = vmatprep.subr.bf16.mxu1 %v707_v36  ;;  %v538_v53 = vpop.permute.xlu0 %537 }
 0x173   : > { %710 = vmatpush1.bf16.msra.mxu1 %v709_v37  ;;  %v523_v46 = vsel %vm521_vm6, %v767_v40, %v766_v41  ;;  %v522_v50 = vsel %vm521_vm6, %v766_v41, %v767_v40 }
 0x174   : > { %712 = vmatprep.subr.bf16.mxu1 %v711_v44  ;;  %v715_v49 = vpack.c.bf16 %v532_v48, %v523_v46  ;;  %v536_v51 = vpop.permute.xlu1 %535  ;;  %v717_v43 = vpack.c.bf16 %v531_v52, %v522_v50 }
 0x175   : > { %v541_v54 = vsel %vm539_vm8, %v538_v53, %v536_v51  ;;  %v540_v42 = vsel %vm539_vm8, %v536_v51, %v538_v53 }
 0x177   : > { %714 = vmatpush1.bf16.msra.mxu1 %v713_v47 }
 0x178   : > { %716 = vmatprep.subr.bf16.mxu1 %v715_v49 }
 0x17b   : > { %718 = vmatpush1.bf16.msra.mxu1 %v717_v43 }
 0x17c   : > { %563 = vmatprep.subr.mxu1 %v541_v54 }
 0x17f   : > { %564 = vmatpush1.msra.mxu1 %v540_v42 }
 0x180   : > { %698 = vmatmul.mubr.msk.f32.vlgmr.msra.gmra.mrb[0].mxu1 %vm543_vm9, %v542_v55 }
 0x253   : > { %v613_v56 = vpop.f32.mrb[0].mxu1 }
 0x254   : > { %618 = vst [vmem:[%s295_s12] sm:$0xff] %v613_v56  ;;  %v615_v57 = vpop.f32.mrb[1].mxu1 }
 0x255   : > { %619 = vst [vmem:[%s295_s12 + $0x8] sm:$0xff] %v615_v57 }
 0x256 PF: > { %s17_s24 = sadd.s32 1, %s779_s24  }
 0x257   : > { %p14_p4 = scmp.ge.s32.totalorder %s17_s24, 4  }
 0x259   :  { %16 = sbr.rel (!%p14_p4) target bundleno = 1 (0x1), region = 81 }

// kernel: dappm_forward.11
= control target key start
LH: loop header
LB: loop body
LE: loop exit
PB: predicated region body
PF: predicated region fallthrough
CT: control target
= control target key end

     0   :  { %s1113_s30 = smov 0   ;;  %s1115_s10 = smov 0   ;;  %s1234_s0 = inlined_call_operand.vmem [shape: f32[56,1], index: 0, kind: input, shape index: {}]   ;;  %s1235_s1 = inlined_call_operand.vmem [shape: f32[56,1], index: 1, kind: input, shape index: {}]   ;;  %s1236_s2 = inlined_call_operand.vmem [shape: f32[16,56], index: 2, kind: input, shape index: {}]   ;;  %s1237_s3 = inlined_call_operand.vmem [shape: f32[2,8,256], index: 3, kind: input, shape index: {}]   ;;  %s1238_s4 = inlined_call_operand.vmem [shape: f32[2,8,256], index: 4, kind: input, shape index: {}]   ;;  %s1239_s5 = inlined_call_operand.vmem [shape: f32[2,8,256], index: 5, kind: input, shape index: {}]   ;;  %s1240_s6 = inlined_call_operand.vmem [shape: f32[2,8,256], index: 6, kind: input, shape index: {}]   ;;  %s1241_s7 = inlined_call_operand.vmem [shape: f32[2,8,256], index: 7, kind: input, shape index: {}]   ;;  %s1242_s8 = inlined_call_operand.vmem [shape: f32[2,16,256], index: 8, kind: input, shape index: {}]   ;;  %s1243_s9 = inlined_call_operand.vmem [shape: f32[2,16,256], index: 9, kind: output, shape index: {}]  }
   0x1   :  { %s1117_s11 = smov 0  }
   0x2 LB: > { %s31_s12 = sadd.s32 1, %s1055_s10  ;;  %p963_p0 = scmp.ge.s32.totalorder %s1059_s11, 1  ;;  %s1059_s11 = sphi %s1117_s11, %s19_s11   ;;  %s1055_s10 = sphi %s1115_s10, %s1245_s10   ;;  %s1051_s30 = sphi %s1113_s30, %s1244_s30  }
   0x3   : > { %p33_p1 = scmp.ge.s32.totalorder %s31_s12, 2  ;;  %p393_p2 = scmp.lt.s32.totalorder %s1059_s11, 3 }
   0x5   : > { %s1247_s12 = smov (%p33_p1, %s31_s12), 0  ;;  %p394_p3 = pnand %p963_p0, %p393_p2 }
   0x6   : > { %v622_v0 = vld [vmem:[%s1235_s1] sm:$0xff] (!%p394_p3)  ;;  %v1061_v2 = vmov (!%p394_p3), 0   ;;  %v623_v3 = vld [vmem:[%s1235_s1 + $0x8] sm:$0xff] (!%p394_p3)  ;;  %v569_v5 = vld [vmem:[%s1234_s0 + $0x18] sm:$0xff] (!%p394_p3)  ;;  %v1062_v15 = vmov (!%p394_p3), 0.0   ;;  %p483_p4 = scmp.lt.s32.totalorder (!%p394_p3), %s1051_s30, 1 }
   0x7   : > { %397 = sbr.rel (%p394_p3) target bundleno = 382 (0x17e), region = 56  ;;  %v566_v1 = vld [vmem:[%s1234_s0] sm:$0xff] (!%p394_p3)  ;;  %1036 = vset.pattern.permute.xlu1 (!%p394_p3), %v1061_v2  ;;  %1035 = vset.pattern.permute.xlu0 (!%p394_p3), %v1061_v2  ;;  %v567_v4 = vld [vmem:[%s1234_s0 + $0x8] sm:$0xff] (!%p394_p3)  ;;  %v568_v6 = vld [vmem:[%s1234_s0 + $0x10] sm:$0xff] (!%p394_p3)  ;;  %vm694_vm0 = vcmask (!%p394_p3), 457728  }
   0x8   : > { %631 = vperm.xlu1 (!%p394_p3), %1036, %v622_v0   ;;  %575 = vperm.xlu0 (!%p394_p3), %1035, %v566_v1   ;;  %v625_v7 = vld [vmem:[%s1235_s1 + $0x18] sm:$0xff] (!%p394_p3)  ;;  %v624_v8 = vld [vmem:[%s1235_s1 + $0x10] sm:$0xff] (!%p394_p3)  ;;  %v571_v9 = vld [vmem:[%s1234_s0 + $0x28] sm:$0xff] (!%p394_p3) }
   0x9   : > { %v570_v10 = vld [vmem:[%s1234_s0 + $0x20] sm:$0xff] (!%p394_p3)  ;;  %v627_v11 = vld [vmem:[%s1235_s1 + $0x28] sm:$0xff] (!%p394_p3)  ;;  %v628_v13 = vld [vmem:[%s1235_s1 + $0x30] sm:$0xff] (!%p394_p3)  ;;  %765 = vmatprep.mubr.f32.mxu0 (!%p394_p3), %v1062_v15  ;;  %771 = vmatprep.mubr.f32.mxu1 (!%p394_p3), %v1062_v15 }
   0xa   : > { %v626_v12 = vld [vmem:[%s1235_s1 + $0x20] sm:$0xff] (!%p394_p3)  ;;  %v572_v14 = vld [vmem:[%s1234_s0 + $0x30] sm:$0xff] (!%p394_p3) }
   0xc   : > { %636 = vperm.xlu1 (!%p394_p3), %1036, %v623_v3   ;;  %580 = vperm.xlu0 (!%p394_p3), %1035, %v567_v4  }
   0xe   : > { %s1249_s30 = smov (!%p483_p4, %s1051_s30), 1 }
   0xf   : > { %s1180_s24 = sshll.u32 %s1249_s30, 4  ;;  %s987_s20 = sshll.u32 %s1249_s30, 5 }
  0x10   : > { %590 = vperm.xlu1 %1036, %v569_v5   ;;  %585 = vperm.xlu0 %1035, %v568_v6   ;;  %s490_s27 = scalar_lea.vmem %s1237_s3, %s1180_s24  ;;  %s500_s13 = scalar_lea.vmem %s1238_s4, %s1180_s24 }
  0x11   : > { %v552_v16 = vld [vmem:[%s490_s27] sm:$0xff]  ;;  %v553_v17 = vld [vmem:[%s490_s27 + $0x8] sm:$0xff]  ;;  %s520_s16 = scalar_lea.vmem %s1240_s6, %s1180_s24  ;;  %s510_s19 = scalar_lea.vmem %s1239_s5, %s1180_s24 }
  0x12   : > { %v554_v22 = vld [vmem:[%s500_s13] sm:$0xff]  ;;  %v555_v23 = vld [vmem:[%s500_s13 + $0x8] sm:$0xff]  ;;  %s1204_s23 = scalar_lea.vmem %s1242_s8, %s987_s20  ;;  %s530_s27 = scalar_lea.vmem %s1241_s7, %s1180_s24 }
  0x13   : > { %v558_v32 = vld [vmem:[%s520_s16] sm:$0xff]  ;;  %v559_v34 = vld [vmem:[%s520_s16 + $0x8] sm:$0xff]  ;;  %s550_s16 = scalar_lea.vmem %s1243_s9, %s987_s20 }
  0x14   : > { %646 = vperm.xlu1 %1036, %v625_v7   ;;  %641 = vperm.xlu0 %1035, %v624_v8   ;;  %v556_v36 = vld [vmem:[%s510_s19] sm:$0xff]  ;;  %v557_v37 = vld [vmem:[%s510_s19 + $0x8] sm:$0xff] }
  0x15   : > { %v562_v58 = vld [vmem:[%s1204_s23] sm:$0xff]  ;;  %v563_v60 = vld [vmem:[%s1204_s23 + $0x8] sm:$0xff] }
  0x16   : > { %v560_v62 = vld [vmem:[%s530_s27] sm:$0xff]  ;;  %v561_v63 = vld [vmem:[%s530_s27 + $0x8] sm:$0xff] }
  0x18   : > { %600 = vperm.xlu1 %1036, %v571_v9   ;;  %595 = vperm.xlu0 %1035, %v570_v10  }
  0x1c   : > { %656 = vperm.xlu1 %1036, %v627_v11   ;;  %651 = vperm.xlu0 %1035, %v626_v12   ;;  %v564_v12 = vld [vmem:[%s1204_s23 + $0x10] sm:$0xff] }
  0x20   : > { %661 = vperm.xlu1 %1036, %v628_v13   ;;  %605 = vperm.xlu0 %1035, %v572_v14   ;;  %v565_v13 = vld [vmem:[%s1204_s23 + $0x18] sm:$0xff] }
  0x87   : > { %v632_v18 = vpop.permute.xlu1 %631  ;;  %v576_v19 = vpop.permute.xlu0 %575 }
  0x88   : > { %v608_v20 = vmul.f32 %v576_v19, %v552_v16  ;;  %v609_v21 = vmul.f32 %v576_v19, %v553_v17 }
  0x8a   : > { %v664_v28 = vadd.f32 %v632_v18, %v608_v20  ;;  %v665_v29 = vadd.f32 %v632_v18, %v609_v21 }
  0x8b   : > { %v637_v24 = vpop.permute.xlu1 %636  ;;  %v581_v25 = vpop.permute.xlu0 %580 }
  0x8c   : > { %v610_v26 = vmul.f32 %v581_v25, %v554_v22  ;;  %v611_v27 = vmul.f32 %v581_v25, %v555_v23  ;;  %v679_v38 = vmax.f32 %v665_v29, 0.0  ;;  %v678_v40 = vmax.f32 %v664_v28, 0.0  ;;  %v692_v28 = vld [vmem:[%s1236_s2] sm:$0xff]  ;;  %v693_v29 = vld [vmem:[%s1236_s2 + $0x8] sm:$0xff] }
  0x8e   : > { %v666_v30 = vadd.f32 %v637_v24, %v610_v26  ;;  %v667_v31 = vadd.f32 %v637_v24, %v611_v27 }
  0x8f   : > { %v591_v33 = vpop.permute.xlu1 %590  ;;  %v586_v35 = vpop.permute.xlu0 %585 }
  0x90   : > { %v681_v39 = vmax.f32 %v667_v31, 0.0  ;;  %v680_v41 = vmax.f32 %v666_v30, 0.0  ;;  %v614_v42 = vmul.f32 %v591_v33, %v558_v32  ;;  %v615_v43 = vmul.f32 %v591_v33, %v559_v34 }
  0x91   : > { %v612_v44 = vmul.f32 %v586_v35, %v556_v36  ;;  %v613_v45 = vmul.f32 %v586_v35, %v557_v37 }
  0x92   : > { %v989_v48 = vpack.c.bf16 %v681_v39, %v679_v38  ;;  %v991_v49 = vpack.c.bf16 %v680_v41, %v678_v40 }
  0x93   : > { %v647_v46 = vpop.permute.xlu1 %646  ;;  %v642_v47 = vpop.permute.xlu0 %641 }
  0x94   : > { %v670_v50 = vadd.f32 %v647_v46, %v614_v42  ;;  %v671_v51 = vadd.f32 %v647_v46, %v615_v43  ;;  %v668_v52 = vadd.f32 %v642_v47, %v612_v44  ;;  %v669_v53 = vadd.f32 %v642_v47, %v613_v45  ;;  %990 = vmatprep.subr.bf16.mxu0 %v989_v48 }
  0x95   : > { %1001 = vmatprep.subr.bf16.mxu1 %v989_v48  ;;  %992 = vmatpush1.bf16.msra.mxu0 %v991_v49 }
  0x96   : > { %v684_v54 = vmax.f32 %v670_v50, 0.0  ;;  %v685_v55 = vmax.f32 %v671_v51, 0.0  ;;  %v682_v56 = vmax.f32 %v668_v52, 0.0  ;;  %v683_v57 = vmax.f32 %v669_v53, 0.0  ;;  %1005 = vmatpush1.bf16.msra.mxu1 %v991_v49 }
  0x97   : > { %v601_v59 = vpop.permute.xlu1 %600  ;;  %v596_v61 = vpop.permute.xlu0 %595 }
  0x98   : > { %v993_v0 = vpack.c.bf16 %v685_v55, %v683_v57  ;;  %v995_v1 = vpack.c.bf16 %v684_v54, %v682_v56  ;;  %v618_v2 = vmul.f32 %v601_v59, %v562_v58  ;;  %v619_v3 = vmul.f32 %v601_v59, %v563_v60 }
  0x99   : > { %v616_v4 = vmul.f32 %v596_v61, %v560_v62  ;;  %v617_v5 = vmul.f32 %v596_v61, %v561_v63 }
  0x9a   : > { %994 = vmatprep.subr.bf16.mxu0 %v993_v0  ;;  %1002 = vmatprep.subr.bf16.mxu1 %v993_v0 }
  0x9b   : > { %v657_v6 = vpop.permute.xlu1 %656  ;;  %v652_v7 = vpop.permute.xlu0 %651  ;;  %996 = vmatpush1.bf16.msra.mxu0 %v995_v1  ;;  %1006 = vmatpush1.bf16.msra.mxu1 %v995_v1 }
  0x9c   : > { %v674_v8 = vadd.f32 %v657_v6, %v618_v2  ;;  %v675_v9 = vadd.f32 %v657_v6, %v619_v3  ;;  %v672_v10 = vadd.f32 %v652_v7, %v616_v4  ;;  %v673_v11 = vadd.f32 %v652_v7, %v617_v5 }
  0x9e   : > { %v688_v14 = vmax.f32 %v674_v8, 0.0  ;;  %v689_v15 = vmax.f32 %v675_v9, 0.0  ;;  %v686_v16 = vmax.f32 %v672_v10, 0.0  ;;  %v687_v17 = vmax.f32 %v673_v11, 0.0 }
  0x9f   : > { %v606_v18 = vpop.permute.xlu0 %605  ;;  %v662_v23 = vpop.permute.xlu1 %661 }
  0xa0   : > { %v620_v19 = vmul.f32 %v606_v18, %v564_v12  ;;  %v621_v20 = vmul.f32 %v606_v18, %v565_v13  ;;  %v997_v21 = vpack.c.bf16 %v689_v15, %v687_v17  ;;  %v999_v22 = vpack.c.bf16 %v688_v14, %v686_v16 }
  0xa2   : > { %v676_v24 = vadd.f32 %v662_v23, %v620_v19  ;;  %v677_v25 = vadd.f32 %v662_v23, %v621_v20  ;;  %998 = vmatprep.subr.bf16.mxu0 %v997_v21  ;;  %1003 = vmatprep.subr.bf16.mxu1 %v997_v21 }
  0xa3   : > { %1000 = vmatpush1.bf16.msra.mxu0 %v999_v22  ;;  %1007 = vmatpush1.bf16.msra.mxu1 %v999_v22 }
  0xa4   : > { %v690_v26 = vmax.f32 %v676_v24, 0.0  ;;  %v691_v27 = vmax.f32 %v677_v25, 0.0 }
  0xa6   : > { %713 = vmatprep.subr.mxu0 %v691_v27  ;;  %1004 = vmatprep.subr.mxu1 %v691_v27 }
  0xa7   : > { %714 = vmatpush1.msra.mxu0 %v690_v26  ;;  %1008 = vmatpush1.msra.mxu1 %v690_v26 }
  0xa8   : > { %978 = vmatmul.mubr.msk.f32.vlgmr.msra.gmra.mrb[0].mxu0 %vm694_vm0, %v692_v28  ;;  %979 = vmatmul.mubr.msk.f32.vlgmr.msra.gmra.mrb[0].mxu1 %vm694_vm0, %v693_v29 }
 0x17b   : > { %v767_v30 = vpop.f32.mrb[0].mxu0  ;;  %v773_v31 = vpop.f32.mrb[0].mxu1 }
 0x17c   : > { %778 = vst [vmem:[%s550_s16] sm:$0xff] %v767_v30  ;;  %780 = vst [vmem:[%s550_s16 + $0x10] sm:$0xff] %v773_v31  ;;  %v769_v32 = vpop.f32.mrb[1].mxu0  ;;  %v775_v33 = vpop.f32.mrb[1].mxu1 }
 0x17d   : > { %779 = vst [vmem:[%s550_s16 + $0x8] sm:$0xff] %v769_v32  ;;  %781 = vst [vmem:[%s550_s16 + $0x18] sm:$0xff] %v775_v33 }
 0x17e PF: > { %s19_s11 = sadd.s32 1, %s1059_s11   ;;  %s1244_s30 = smov %s1055_s10 }
 0x17f   : > { %p16_p5 = scmp.ge.s32.totalorder %s19_s11, 4   ;;  %s1245_s10 = smov %s1247_s12 }
 0x181   :  { %18 = sbr.rel (!%p16_p5) target bundleno = 2 (0x2), region = 101 }

</bundles_post_ra>
